<compile_context>
chip_gen: v7x
topology: tpu7x:2x2x1
jax: 0.10.0
libtpu: 0.0.40
codegen_flags: <defaults>
</compile_context>

<pallas_src>
import functools
import math

import jax
import jax.numpy as jnp
from jax.experimental import pallas as pl
from jax.experimental.pallas import tpu as pltpu


# ----------------------------------------------------------------------------
# Fused decoder-block kernel (one grid step per batch element)
# ----------------------------------------------------------------------------

def _decoder_block_kernel(
    # activations / masks
    enc_ref, tgt_ref, dbias_ref, mbias_ref,
    # masked self-attention (fused QKV) + LN1
    wqkv1_ref, bqkv1_ref, wo1_ref, bo1_ref, g1_ref, be1_ref,
    # cross-attention (Q, fused KV) + LN2
    wq2_ref, bq2_ref, wkv2_ref, bkv2_ref, wo2_ref, bo2_ref, g2_ref, be2_ref,
    # feed-forward + LN3
    fw1_ref, fb1_ref, fw2_ref, fb2_ref, g3_ref, be3_ref,
    # outputs
    out_ref, attw_ref,
    # scratch
    ctx_ref,
    *, num_heads):
    tgt = tgt_ref[0]                       # (St, D) f32
    enc = enc_ref[0]                       # (Se, D) f32
    dbias = dbias_ref[0, 0]                # (St, St) additive mask
    mbias = mbias_ref[0, 0]                # (St, Se) additive mask

    d_model = tgt.shape[-1]
    d_head = d_model // num_heads
    scale = 1.0 / math.sqrt(float(d_head))

    def layer_norm(z, g_ref, b_ref):
        mean = jnp.mean(z, axis=-1, keepdims=True)
        var = jnp.mean((z - mean) ** 2, axis=-1, keepdims=True)
        return (z - mean) * jax.lax.rsqrt(var + 1e-5) * g_ref[...] + b_ref[...]

    def mha(q, k, v, bias, w_out_ref=None):
        """q: (Sq, D), k/v: (Sk, D), bias: (Sq, Sk) additive.

        Static per-head loop; context is written lane-dense into ctx_ref so
        the merged (Sq, H*Dh) = (Sq, D) context needs no transpose.  If
        w_out_ref is given, the (exact) softmax weights are written per head.
        """
        qb = q.astype(jnp.bfloat16)
        kb = k.astype(jnp.bfloat16)
        vb = v.astype(jnp.bfloat16)
        for h in range(num_heads):
            lo = h * d_head
            hi = lo + d_head
            s = jnp.einsum("qd,kd->qk", qb[:, lo:hi], kb[:, lo:hi],
                           preferred_element_type=jnp.float32)
            s = s * scale + bias
            m = jnp.max(s, axis=-1, keepdims=True)
            p = jnp.exp(s - m)
            denom = jnp.sum(p, axis=-1, keepdims=True)
            if w_out_ref is None:
                # not returned -> approximate reciprocal on the EUP slot
                w = p * pl.reciprocal(denom, approx=True)
            else:
                # returned to the user -> exact softmax (rows sum to 1)
                w = p / denom
                w_out_ref[0, h] = w
            ctx_ref[:, lo:hi] = jnp.dot(w.astype(jnp.bfloat16), vb[:, lo:hi],
                                        preferred_element_type=jnp.float32)
        return ctx_ref[...]

    # ---- 1) masked self-attention + output proj + residual + LayerNorm1 ----
    qkv = jnp.dot(tgt.astype(jnp.bfloat16), wqkv1_ref[...],
                  preferred_element_type=jnp.float32) + bqkv1_ref[...]
    ctx1 = mha(qkv[:, 0:d_model],
               qkv[:, d_model:2 * d_model],
               qkv[:, 2 * d_model:3 * d_model],
               dbias)
    attn1 = jnp.dot(ctx1.astype(jnp.bfloat16), wo1_ref[...],
                    preferred_element_type=jnp.float32) + bo1_ref[...]
    x1 = layer_norm(attn1 + tgt, g1_ref, be1_ref)

    # ---- 2) cross-attention + output proj + residual + LayerNorm2 ----
    q2 = jnp.dot(x1.astype(jnp.bfloat16), wq2_ref[...],
                 preferred_element_type=jnp.float32) + bq2_ref[...]
    kv2 = jnp.dot(enc.astype(jnp.bfloat16), wkv2_ref[...],
                  preferred_element_type=jnp.float32) + bkv2_ref[...]
    ctx2 = mha(q2,
               kv2[:, 0:d_model],
               kv2[:, d_model:2 * d_model],
               mbias,
               w_out_ref=attw_ref)
    attn2 = jnp.dot(ctx2.astype(jnp.bfloat16), wo2_ref[...],
                    preferred_element_type=jnp.float32) + bo2_ref[...]
    x2 = layer_norm(attn2 + x1, g2_ref, be2_ref)

    # ---- 3) feed-forward + residual + LayerNorm3 ----
    hdn = jnp.maximum(
        jnp.dot(x2.astype(jnp.bfloat16), fw1_ref[...],
                preferred_element_type=jnp.float32) + fb1_ref[...], 0.0)
    y = jnp.dot(hdn.astype(jnp.bfloat16), fw2_ref[...],
                preferred_element_type=jnp.float32) + fb2_ref[...]
    out_ref[0] = layer_norm(y + x2, g3_ref, be3_ref)


# ----------------------------------------------------------------------------
# Wrapper: one pallas_call for the whole decoder block
# ----------------------------------------------------------------------------

def decoder_block_forward(params, encoder_output, target, decoder_mask,
                          memory_mask, *, num_heads):
    """encoder_output: (B, Se, D); target: (B, St, D);
    decoder_mask: (B, 1, St, St); memory_mask: (B, 1, St, Se) (1=visible, 0=masked).
    Returns (output (B, St, D), cross-attention weights (B, H, St, Se))."""
    B, St, D = target.shape
    Se = encoder_output.shape[1]
    Hid = params["ffn_w1t"].shape[1]
    H = num_heads

    # Additive masks: 0 where visible, -1e30 where masked (no -inf -> no NaN).
    dec_bias = jnp.where(decoder_mask == 0, jnp.float32(-1e30), jnp.float32(0.0))
    mem_bias = jnp.where(memory_mask == 0, jnp.float32(-1e30), jnp.float32(0.0))

    def cspec(shape):
        # Weight / bias blocks are constant across the batch grid (resident).
        return pl.BlockSpec(shape, lambda b, _n=len(shape): (0,) * _n)

    m1 = params["mhsa1"]
    m2 = params["mhsa2"]

    kernel = functools.partial(_decoder_block_kernel, num_heads=num_heads)

    out, attw = pl.pallas_call(
        kernel,
        out_shape=(
            jax.ShapeDtypeStruct((B, St, D), jnp.float32),
            jax.ShapeDtypeStruct((B, H, St, Se), jnp.float32),
        ),
        grid=(B,),
        in_specs=[
            pl.BlockSpec((1, Se, D), lambda b: (b, 0, 0)),
            pl.BlockSpec((1, St, D), lambda b: (b, 0, 0)),
            pl.BlockSpec((1, 1, St, St), lambda b: (b, 0, 0, 0)),
            pl.BlockSpec((1, 1, St, Se), lambda b: (b, 0, 0, 0)),
            # self-attention + LN1
            cspec((D, 3 * D)), cspec((1, 3 * D)),
            cspec((D, D)), cspec((1, D)),
            cspec((1, D)), cspec((1, D)),
            # cross-attention + LN2
            cspec((D, D)), cspec((1, D)),
            cspec((D, 2 * D)), cspec((1, 2 * D)),
            cspec((D, D)), cspec((1, D)),
            cspec((1, D)), cspec((1, D)),
            # FFN + LN3
            cspec((D, Hid)), cspec((1, Hid)),
            cspec((Hid, D)), cspec((1, D)),
            cspec((1, D)), cspec((1, D)),
        ],
        out_specs=(
            pl.BlockSpec((1, St, D), lambda b: (b, 0, 0)),
            pl.BlockSpec((1, H, St, Se), lambda b: (b, 0, 0, 0)),
        ),
        scratch_shapes=[pltpu.VMEM((St, D), jnp.float32)],
        compiler_params=pltpu.CompilerParams(
            dimension_semantics=("parallel",)),
    )(
        encoder_output, target, dec_bias, mem_bias,
        m1["wqkv"], m1["bqkv"], m1["wo"], m1["bo"],
        params["ln1_g"], params["ln1_b"],
        m2["wq"], m2["bq"], m2["wkv"], m2["bkv"], m2["wo"], m2["bo"],
        params["ln2_g"], params["ln2_b"],
        params["ffn_w1t"], params["ffn_b1"], params["ffn_w2t"], params["ffn_b2"],
        params["ln3_g"], params["ln3_b"],
    )
    return out, attw


# ----------------------------------------------------------------------------
# Parameter init (PyTorch layout) + kernel-ready prep (transposed bf16, fused)
# ----------------------------------------------------------------------------

class _KeyGen:
    def __init__(self, key):
        self._key = key

    def __call__(self):
        self._key, sub = jax.random.split(self._key)
        return sub


def init_decoder_block_params(key, d_model, hidden_dim):
    kg = _KeyGen(key)

    def lin(d_out, d_in):
        s = 1.0 / math.sqrt(d_in)
        w = jax.random.uniform(kg(), (d_out, d_in), jnp.float32, -s, s)
        b = jax.random.uniform(kg(), (d_out,), jnp.float32, -s, s)
        return w, b

    def mhsa():
        wq_w, wq_b = lin(d_model, d_model)
        wk_w, wk_b = lin(d_model, d_model)
        wv_w, wv_b = lin(d_model, d_model)
        wo_w, wo_b = lin(d_model, d_model)
        return dict(wq_w=wq_w, wq_b=wq_b, wk_w=wk_w, wk_b=wk_b,
                    wv_w=wv_w, wv_b=wv_b, wo_w=wo_w, wo_b=wo_b)

    ffn_w1, ffn_b1 = lin(hidden_dim, d_model)
    ffn_w2, ffn_b2 = lin(d_model, hidden_dim)
    return dict(
        mhsa1=mhsa(), mhsa2=mhsa(),
        ffn_w1=ffn_w1, ffn_b1=ffn_b1, ffn_w2=ffn_w2, ffn_b2=ffn_b2,
        ln1_g=jnp.ones((d_model,), jnp.float32),
        ln1_b=jnp.zeros((d_model,), jnp.float32),
        ln2_g=jnp.ones((d_model,), jnp.float32),
        ln2_b=jnp.zeros((d_model,), jnp.float32),
        ln3_g=jnp.ones((d_model,), jnp.float32),
        ln3_b=jnp.zeros((d_model,), jnp.float32),
    )


def prepare_params(raw):
    """PyTorch-layout params -> kernel-ready (pre-transposed bf16, fused QKV/KV)."""
    def t16(w):
        return w.T.astype(jnp.bfloat16)

    def row(b):
        return b.reshape(1, -1).astype(jnp.float32)

    m1, m2 = raw["mhsa1"], raw["mhsa2"]
    return dict(
        mhsa1=dict(
            wqkv=jnp.concatenate([m1["wq_w"].T, m1["wk_w"].T, m1["wv_w"].T],
                                 axis=1).astype(jnp.bfloat16),
            bqkv=row(jnp.concatenate([m1["wq_b"], m1["wk_b"], m1["wv_b"]])),
            wo=t16(m1["wo_w"]), bo=row(m1["wo_b"]),
        ),
        mhsa2=dict(
            wq=t16(m2["wq_w"]), bq=row(m2["wq_b"]),
            wkv=jnp.concatenate([m2["wk_w"].T, m2["wv_w"].T],
                                axis=1).astype(jnp.bfloat16),
            bkv=row(jnp.concatenate([m2["wk_b"], m2["wv_b"]])),
            wo=t16(m2["wo_w"]), bo=row(m2["wo_b"]),
        ),
        ffn_w1t=t16(raw["ffn_w1"]), ffn_b1=row(raw["ffn_b1"]),
        ffn_w2t=t16(raw["ffn_w2"]), ffn_b2=row(raw["ffn_b2"]),
        ln1_g=row(raw["ln1_g"]), ln1_b=row(raw["ln1_b"]),
        ln2_g=row(raw["ln2_g"]), ln2_b=row(raw["ln2_b"]),
        ln3_g=row(raw["ln3_g"]), ln3_b=row(raw["ln3_b"]),
    )


# ----------------------------------------------------------------------------
# Pure-JAX reference (f32), mirroring the PyTorch DecoderBlock
# ----------------------------------------------------------------------------

def reference_decoder_block(raw, encoder_output, target, decoder_mask,
                            memory_mask, num_heads):
    def layer_norm(x, g, b):
        mu = x.mean(-1, keepdims=True)
        var = ((x - mu) ** 2).mean(-1, keepdims=True)
        return (x - mu) / jnp.sqrt(var + 1e-5) * g + b

    def mhsa(m, q_in, kv_in, mask):
        B, Sq, D = q_in.shape
        Sk = kv_in.shape[1]
        dh = D // num_heads
        q = q_in @ m["wq_w"].T + m["wq_b"]
        k = kv_in @ m["wk_w"].T + m["wk_b"]
        v = kv_in @ m["wv_w"].T + m["wv_b"]

        def split(x, S):
            return x.reshape(B, S, num_heads, dh).transpose(0, 2, 1, 3)

        qs, ks, vs = split(q, Sq), split(k, Sk), split(v, Sk)
        s = jnp.einsum("bhqd,bhkd->bhqk", qs, ks) / math.sqrt(float(dh))
        s = jnp.where(mask == 0, -jnp.inf, s)
        w = jax.nn.softmax(s, axis=-1)
        ctx = jnp.einsum("bhqk,bhkd->bhqd", w, vs)
        ctx = ctx.transpose(0, 2, 1, 3).reshape(B, Sq, D)
        return ctx @ m["wo_w"].T + m["wo_b"], w

    a1, _ = mhsa(raw["mhsa1"], target, target, decoder_mask)
    x1 = layer_norm(a1 + target, raw["ln1_g"], raw["ln1_b"])
    a2, attw = mhsa(raw["mhsa2"], x1, encoder_output, memory_mask)
    x2 = layer_norm(a2 + x1, raw["ln2_g"], raw["ln2_b"])
    h = jnp.maximum(x2 @ raw["ffn_w1"].T + raw["ffn_b1"], 0.0)
    y = h @ raw["ffn_w2"].T + raw["ffn_b2"]
    return layer_norm(y + x2, raw["ln3_g"], raw["ln3_b"]), attw


# ----------------------------------------------------------------------------
# Main
# ----------------------------------------------------------------------------

if __name__ == "__main__":
    d_model = 32
    num_heads = 4
    hidden_dim = 64
    batch = 2
    tgt_len = 8
    enc_len = 8

    root = jax.random.PRNGKey(0)
    k_params, k_tgt, k_enc = jax.random.split(root, 3)

    raw_params = init_decoder_block_params(k_params, d_model, hidden_dim)
    params = prepare_params(raw_params)

    target = jax.random.normal(k_tgt, (batch, tgt_len, d_model), jnp.float32)
    encoder_output = jax.random.normal(k_enc, (batch, enc_len, d_model),
                                       jnp.float32)

    # Causal decoder mask (B, 1, St, St); memory mask all-ones (B, 1, St, Se).
    causal = jnp.tril(jnp.ones((tgt_len, tgt_len), jnp.float32))
    decoder_mask = jnp.tile(causal[None, None, :, :], (batch, 1, 1, 1))
    memory_mask = jnp.ones((batch, 1, tgt_len, enc_len), jnp.float32)

    fwd = jax.jit(functools.partial(decoder_block_forward, num_heads=num_heads))
    out, attn_weights = fwd(params, encoder_output, target, decoder_mask,
                            memory_mask)
    out = jax.block_until_ready(out)
    attn_weights = jax.block_until_ready(attn_weights)

    ref_out, ref_attw = reference_decoder_block(
        raw_params, encoder_output, target, decoder_mask, memory_mask, num_heads)

    assert out.shape == (batch, tgt_len, d_model)
    assert attn_weights.shape == (batch, num_heads, tgt_len, enc_len)
    assert jnp.all(jnp.isfinite(out))
    assert jnp.all(jnp.isfinite(attn_weights))
    # bf16 MXU operands vs f32 reference -> loose tolerances.
    assert jnp.max(jnp.abs(out - ref_out)) < 1e-1
    assert jnp.max(jnp.abs(attn_weights - ref_attw)) < 5e-2
    print("KERNEL_OK")
</pallas_src>

<mosaic_0001>
module attributes {stable_mosaic.version = 11 : i64} {
  func.func @_decoder_block_kernel(%arg0: i32, %arg1: memref<1x8x32xf32, #tpu.memory_space<vmem>>, %arg2: memref<1x8x32xf32, #tpu.memory_space<vmem>>, %arg3: memref<1x1x8x8xf32, #tpu.memory_space<vmem>>, %arg4: memref<1x1x8x8xf32, #tpu.memory_space<vmem>>, %arg5: memref<32x96xbf16, #tpu.memory_space<vmem>>, %arg6: memref<1x96xf32, #tpu.memory_space<vmem>>, %arg7: memref<32x32xbf16, #tpu.memory_space<vmem>>, %arg8: memref<1x32xf32, #tpu.memory_space<vmem>>, %arg9: memref<1x32xf32, #tpu.memory_space<vmem>>, %arg10: memref<1x32xf32, #tpu.memory_space<vmem>>, %arg11: memref<32x32xbf16, #tpu.memory_space<vmem>>, %arg12: memref<1x32xf32, #tpu.memory_space<vmem>>, %arg13: memref<32x64xbf16, #tpu.memory_space<vmem>>, %arg14: memref<1x64xf32, #tpu.memory_space<vmem>>, %arg15: memref<32x32xbf16, #tpu.memory_space<vmem>>, %arg16: memref<1x32xf32, #tpu.memory_space<vmem>>, %arg17: memref<1x32xf32, #tpu.memory_space<vmem>>, %arg18: memref<1x32xf32, #tpu.memory_space<vmem>>, %arg19: memref<32x64xbf16, #tpu.memory_space<vmem>>, %arg20: memref<1x64xf32, #tpu.memory_space<vmem>>, %arg21: memref<64x32xbf16, #tpu.memory_space<vmem>>, %arg22: memref<1x32xf32, #tpu.memory_space<vmem>>, %arg23: memref<1x32xf32, #tpu.memory_space<vmem>>, %arg24: memref<1x32xf32, #tpu.memory_space<vmem>>, %arg25: memref<1x8x32xf32, #tpu.memory_space<vmem>>, %arg26: memref<1x4x8x8xf32, #tpu.memory_space<vmem>>, %arg27: memref<8x32xf32, #tpu.memory_space<vmem>>) attributes {dimension_semantics = [#tpu.dimension_semantics<parallel>], iteration_bounds = array<i64: 2>, scalar_prefetch = 0 : i64, scratch_operands = 1 : i64, tpu.core_type = #tpu.core_type<tc>, window_params = [{transform_indices = @transform_0, window_bounds = array<i64: 1, 8, 32>}, {transform_indices = @transform_1, window_bounds = array<i64: 1, 8, 32>}, {transform_indices = @transform_2, window_bounds = array<i64: 1, 1, 8, 8>}, {transform_indices = @transform_3, window_bounds = array<i64: 1, 1, 8, 8>}, {pipeline_mode = #tpu.pipeline_mode<synchronous>, transform_indices = @transform_4, window_bounds = array<i64: 32, 96>}, {pipeline_mode = #tpu.pipeline_mode<synchronous>, transform_indices = @transform_5, window_bounds = array<i64: 1, 96>}, {pipeline_mode = #tpu.pipeline_mode<synchronous>, transform_indices = @transform_6, window_bounds = array<i64: 32, 32>}, {pipeline_mode = #tpu.pipeline_mode<synchronous>, transform_indices = @transform_7, window_bounds = array<i64: 1, 32>}, {pipeline_mode = #tpu.pipeline_mode<synchronous>, transform_indices = @transform_8, window_bounds = array<i64: 1, 32>}, {pipeline_mode = #tpu.pipeline_mode<synchronous>, transform_indices = @transform_9, window_bounds = array<i64: 1, 32>}, {pipeline_mode = #tpu.pipeline_mode<synchronous>, transform_indices = @transform_10, window_bounds = array<i64: 32, 32>}, {pipeline_mode = #tpu.pipeline_mode<synchronous>, transform_indices = @transform_11, window_bounds = array<i64: 1, 32>}, {pipeline_mode = #tpu.pipeline_mode<synchronous>, transform_indices = @transform_12, window_bounds = array<i64: 32, 64>}, {pipeline_mode = #tpu.pipeline_mode<synchronous>, transform_indices = @transform_13, window_bounds = array<i64: 1, 64>}, {pipeline_mode = #tpu.pipeline_mode<synchronous>, transform_indices = @transform_14, window_bounds = array<i64: 32, 32>}, {pipeline_mode = #tpu.pipeline_mode<synchronous>, transform_indices = @transform_15, window_bounds = array<i64: 1, 32>}, {pipeline_mode = #tpu.pipeline_mode<synchronous>, transform_indices = @transform_16, window_bounds = array<i64: 1, 32>}, {pipeline_mode = #tpu.pipeline_mode<synchronous>, transform_indices = @transform_17, window_bounds = array<i64: 1, 32>}, {pipeline_mode = #tpu.pipeline_mode<synchronous>, transform_indices = @transform_18, window_bounds = array<i64: 32, 64>}, {pipeline_mode = #tpu.pipeline_mode<synchronous>, transform_indices = @transform_19, window_bounds = array<i64: 1, 64>}, {pipeline_mode = #tpu.pipeline_mode<synchronous>, transform_indices = @transform_20, window_bounds = array<i64: 64, 32>}, {pipeline_mode = #tpu.pipeline_mode<synchronous>, transform_indices = @transform_21, window_bounds = array<i64: 1, 32>}, {pipeline_mode = #tpu.pipeline_mode<synchronous>, transform_indices = @transform_22, window_bounds = array<i64: 1, 32>}, {pipeline_mode = #tpu.pipeline_mode<synchronous>, transform_indices = @transform_23, window_bounds = array<i64: 1, 32>}, {transform_indices = @transform_24, window_bounds = array<i64: 1, 8, 32>}, {transform_indices = @transform_25, window_bounds = array<i64: 1, 4, 8, 8>}]} {
    %c0 = arith.constant 0 : index
    %c0_0 = arith.constant 0 : index
    %c0_1 = arith.constant 0 : index
    %0 = vector.load %arg2[%c0, %c0_0, %c0_1] : memref<1x8x32xf32, #tpu.memory_space<vmem>>, vector<1x8x32xf32>
    %1 = vector.shape_cast %0 : vector<1x8x32xf32> to vector<8x32xf32>
    %c0_2 = arith.constant 0 : index
    %c0_3 = arith.constant 0 : index
    %c0_4 = arith.constant 0 : index
    %2 = vector.load %arg1[%c0_2, %c0_3, %c0_4] : memref<1x8x32xf32, #tpu.memory_space<vmem>>, vector<1x8x32xf32>
    %3 = vector.shape_cast %2 : vector<1x8x32xf32> to vector<8x32xf32>
    %c0_5 = arith.constant 0 : index
    %c0_6 = arith.constant 0 : index
    %c0_7 = arith.constant 0 : index
    %c0_8 = arith.constant 0 : index
    %4 = vector.load %arg3[%c0_5, %c0_6, %c0_7, %c0_8] : memref<1x1x8x8xf32, #tpu.memory_space<vmem>>, vector<1x1x8x8xf32>
    %5 = vector.shape_cast %4 : vector<1x1x8x8xf32> to vector<8x8xf32>
    %c0_9 = arith.constant 0 : index
    %c0_10 = arith.constant 0 : index
    %c0_11 = arith.constant 0 : index
    %c0_12 = arith.constant 0 : index
    %6 = vector.load %arg4[%c0_9, %c0_10, %c0_11, %c0_12] : memref<1x1x8x8xf32, #tpu.memory_space<vmem>>, vector<1x1x8x8xf32>
    %7 = vector.shape_cast %6 : vector<1x1x8x8xf32> to vector<8x8xf32>
    %8 = arith.truncf %1 : vector<8x32xf32> to vector<8x32xbf16>
    %c0_13 = arith.constant 0 : index
    %c0_14 = arith.constant 0 : index
    %9 = vector.load %arg5[%c0_13, %c0_14] : memref<32x96xbf16, #tpu.memory_space<vmem>>, vector<32x96xbf16>
    %cst = arith.constant dense<0.000000e+00> : vector<8x96xf32>
    %10 = tpu.matmul %8, %9, %cst {dimension_numbers = #tpu.dot_dimension_numbers<[1], [0], [0], [1], [0, 0, 1, 1], [], []>} : vector<8x32xbf16>, vector<32x96xbf16>, vector<8x96xf32> -> vector<8x96xf32>
    %c0_15 = arith.constant 0 : index
    %c0_16 = arith.constant 0 : index
    %11 = vector.load %arg6[%c0_15, %c0_16] : memref<1x96xf32, #tpu.memory_space<vmem>>, vector<1x96xf32>
    %12 = vector.broadcast %11 : vector<1x96xf32> to vector<8x96xf32>
    %13 = arith.addf %10, %12 : vector<8x96xf32>
    %14 = vector.extract_strided_slice %13 {offsets = [0, 0], sizes = [8, 32], strides = [1, 1]} : vector<8x96xf32> to vector<8x32xf32>
    %15 = vector.extract_strided_slice %13 {offsets = [0, 32], sizes = [8, 32], strides = [1, 1]} : vector<8x96xf32> to vector<8x32xf32>
    %16 = vector.extract_strided_slice %13 {offsets = [0, 64], sizes = [8, 32], strides = [1, 1]} : vector<8x96xf32> to vector<8x32xf32>
    %17 = arith.truncf %14 : vector<8x32xf32> to vector<8x32xbf16>
    %18 = arith.truncf %15 : vector<8x32xf32> to vector<8x32xbf16>
    %19 = arith.truncf %16 : vector<8x32xf32> to vector<8x32xbf16>
    %20 = vector.extract_strided_slice %17 {offsets = [0, 0], sizes = [8, 8], strides = [1, 1]} : vector<8x32xbf16> to vector<8x8xbf16>
    %21 = vector.extract_strided_slice %18 {offsets = [0, 0], sizes = [8, 8], strides = [1, 1]} : vector<8x32xbf16> to vector<8x8xbf16>
    "tpu.trace_start"() <{level = 10 : i32, message = "qd,kd->qk"}> : () -> ()
    %cst_17 = arith.constant dense<0.000000e+00> : vector<8x8xf32>
    %22 = tpu.matmul %20, %21, %cst_17 {dimension_numbers = #tpu.dot_dimension_numbers<[1], [1], [0], [0], [0, 0, 1, 0], [], []>} : vector<8x8xbf16>, vector<8x8xbf16>, vector<8x8xf32> -> vector<8x8xf32>
    "tpu.trace_stop"() : () -> ()
    %cst_18 = arith.constant 0.353553385 : f32
    %23 = vector.broadcast %cst_18 : f32 to vector<8x8xf32>
    %24 = arith.mulf %22, %23 : vector<8x8xf32>
    %25 = arith.addf %24, %5 : vector<8x8xf32>
    %cst_19 = arith.constant dense<0xFF800000> : vector<8xf32>
    %26 = vector.multi_reduction <maximumf>, %25, %cst_19 [1] : vector<8x8xf32> to vector<8xf32>
    %27 = vector.shape_cast %26 : vector<8xf32> to vector<8x1xf32>
    %28 = vector.broadcast %27 : vector<8x1xf32> to vector<8x8xf32>
    %29 = arith.subf %25, %28 : vector<8x8xf32>
    %30 = math.exp %29 : vector<8x8xf32>
    %cst_20 = arith.constant dense<0.000000e+00> : vector<8xf32>
    %31 = vector.multi_reduction <add>, %30, %cst_20 [1] : vector<8x8xf32> to vector<8xf32>
    %32 = vector.shape_cast %31 : vector<8xf32> to vector<8x1xf32>
    %33 = tpu.reciprocal %32 {approx = true} : vector<8x1xf32> -> vector<8x1xf32>
    %34 = vector.broadcast %33 : vector<8x1xf32> to vector<8x8xf32>
    %35 = arith.mulf %30, %34 : vector<8x8xf32>
    %36 = arith.truncf %35 : vector<8x8xf32> to vector<8x8xbf16>
    %37 = vector.extract_strided_slice %19 {offsets = [0, 0], sizes = [8, 8], strides = [1, 1]} : vector<8x32xbf16> to vector<8x8xbf16>
    %cst_21 = arith.constant dense<0.000000e+00> : vector<8x8xf32>
    %38 = tpu.matmul %36, %37, %cst_21 {dimension_numbers = #tpu.dot_dimension_numbers<[1], [0], [0], [1], [0, 0, 1, 1], [], []>} : vector<8x8xbf16>, vector<8x8xbf16>, vector<8x8xf32> -> vector<8x8xf32>
    %c0_22 = arith.constant 0 : index
    %c0_23 = arith.constant 0 : index
    %39 = vector.load %arg27[%c0_22, %c0_23] : memref<8x32xf32, #tpu.memory_space<vmem>>, vector<8x8xf32>
    tpu.vector_store %arg27[%c0_22, %c0_23], %38 {strides = array<i32>} : memref<8x32xf32, #tpu.memory_space<vmem>>, vector<8x8xf32>,
    %40 = vector.extract_strided_slice %17 {offsets = [0, 8], sizes = [8, 8], strides = [1, 1]} : vector<8x32xbf16> to vector<8x8xbf16>
    %41 = vector.extract_strided_slice %18 {offsets = [0, 8], sizes = [8, 8], strides = [1, 1]} : vector<8x32xbf16> to vector<8x8xbf16>
    "tpu.trace_start"() <{level = 10 : i32, message = "qd,kd->qk"}> : () -> ()
    %cst_24 = arith.constant dense<0.000000e+00> : vector<8x8xf32>
    %42 = tpu.matmul %40, %41, %cst_24 {dimension_numbers = #tpu.dot_dimension_numbers<[1], [1], [0], [0], [0, 0, 1, 0], [], []>} : vector<8x8xbf16>, vector<8x8xbf16>, vector<8x8xf32> -> vector<8x8xf32>
    "tpu.trace_stop"() : () -> ()
    %cst_25 = arith.constant 0.353553385 : f32
    %43 = vector.broadcast %cst_25 : f32 to vector<8x8xf32>
    %44 = arith.mulf %42, %43 : vector<8x8xf32>
    %45 = arith.addf %44, %5 : vector<8x8xf32>
    %cst_26 = arith.constant dense<0xFF800000> : vector<8xf32>
    %46 = vector.multi_reduction <maximumf>, %45, %cst_26 [1] : vector<8x8xf32> to vector<8xf32>
    %47 = vector.shape_cast %46 : vector<8xf32> to vector<8x1xf32>
    %48 = vector.broadcast %47 : vector<8x1xf32> to vector<8x8xf32>
    %49 = arith.subf %45, %48 : vector<8x8xf32>
    %50 = math.exp %49 : vector<8x8xf32>
    %cst_27 = arith.constant dense<0.000000e+00> : vector<8xf32>
    %51 = vector.multi_reduction <add>, %50, %cst_27 [1] : vector<8x8xf32> to vector<8xf32>
    %52 = vector.shape_cast %51 : vector<8xf32> to vector<8x1xf32>
    %53 = tpu.reciprocal %52 {approx = true} : vector<8x1xf32> -> vector<8x1xf32>
    %54 = vector.broadcast %53 : vector<8x1xf32> to vector<8x8xf32>
    %55 = arith.mulf %50, %54 : vector<8x8xf32>
    %56 = arith.truncf %55 : vector<8x8xf32> to vector<8x8xbf16>
    %57 = vector.extract_strided_slice %19 {offsets = [0, 8], sizes = [8, 8], strides = [1, 1]} : vector<8x32xbf16> to vector<8x8xbf16>
    %cst_28 = arith.constant dense<0.000000e+00> : vector<8x8xf32>
    %58 = tpu.matmul %56, %57, %cst_28 {dimension_numbers = #tpu.dot_dimension_numbers<[1], [0], [0], [1], [0, 0, 1, 1], [], []>} : vector<8x8xbf16>, vector<8x8xbf16>, vector<8x8xf32> -> vector<8x8xf32>
    %c0_29 = arith.constant 0 : index
    %c8 = arith.constant 8 : index
    %59 = vector.load %arg27[%c0_29, %c8] : memref<8x32xf32, #tpu.memory_space<vmem>>, vector<8x8xf32>
    tpu.vector_store %arg27[%c0_29, %c8], %58 {strides = array<i32>} : memref<8x32xf32, #tpu.memory_space<vmem>>, vector<8x8xf32>,
    %60 = vector.extract_strided_slice %17 {offsets = [0, 16], sizes = [8, 8], strides = [1, 1]} : vector<8x32xbf16> to vector<8x8xbf16>
    %61 = vector.extract_strided_slice %18 {offsets = [0, 16], sizes = [8, 8], strides = [1, 1]} : vector<8x32xbf16> to vector<8x8xbf16>
    "tpu.trace_start"() <{level = 10 : i32, message = "qd,kd->qk"}> : () -> ()
    %cst_30 = arith.constant dense<0.000000e+00> : vector<8x8xf32>
    %62 = tpu.matmul %60, %61, %cst_30 {dimension_numbers = #tpu.dot_dimension_numbers<[1], [1], [0], [0], [0, 0, 1, 0], [], []>} : vector<8x8xbf16>, vector<8x8xbf16>, vector<8x8xf32> -> vector<8x8xf32>
    "tpu.trace_stop"() : () -> ()
    %cst_31 = arith.constant 0.353553385 : f32
    %63 = vector.broadcast %cst_31 : f32 to vector<8x8xf32>
    %64 = arith.mulf %62, %63 : vector<8x8xf32>
    %65 = arith.addf %64, %5 : vector<8x8xf32>
    %cst_32 = arith.constant dense<0xFF800000> : vector<8xf32>
    %66 = vector.multi_reduction <maximumf>, %65, %cst_32 [1] : vector<8x8xf32> to vector<8xf32>
    %67 = vector.shape_cast %66 : vector<8xf32> to vector<8x1xf32>
    %68 = vector.broadcast %67 : vector<8x1xf32> to vector<8x8xf32>
    %69 = arith.subf %65, %68 : vector<8x8xf32>
    %70 = math.exp %69 : vector<8x8xf32>
    %cst_33 = arith.constant dense<0.000000e+00> : vector<8xf32>
    %71 = vector.multi_reduction <add>, %70, %cst_33 [1] : vector<8x8xf32> to vector<8xf32>
    %72 = vector.shape_cast %71 : vector<8xf32> to vector<8x1xf32>
    %73 = tpu.reciprocal %72 {approx = true} : vector<8x1xf32> -> vector<8x1xf32>
    %74 = vector.broadcast %73 : vector<8x1xf32> to vector<8x8xf32>
    %75 = arith.mulf %70, %74 : vector<8x8xf32>
    %76 = arith.truncf %75 : vector<8x8xf32> to vector<8x8xbf16>
    %77 = vector.extract_strided_slice %19 {offsets = [0, 16], sizes = [8, 8], strides = [1, 1]} : vector<8x32xbf16> to vector<8x8xbf16>
    %cst_34 = arith.constant dense<0.000000e+00> : vector<8x8xf32>
    %78 = tpu.matmul %76, %77, %cst_34 {dimension_numbers = #tpu.dot_dimension_numbers<[1], [0], [0], [1], [0, 0, 1, 1], [], []>} : vector<8x8xbf16>, vector<8x8xbf16>, vector<8x8xf32> -> vector<8x8xf32>
    %c0_35 = arith.constant 0 : index
    %c16 = arith.constant 16 : index
    %79 = vector.load %arg27[%c0_35, %c16] : memref<8x32xf32, #tpu.memory_space<vmem>>, vector<8x8xf32>
    tpu.vector_store %arg27[%c0_35, %c16], %78 {strides = array<i32>} : memref<8x32xf32, #tpu.memory_space<vmem>>, vector<8x8xf32>,
    %80 = vector.extract_strided_slice %17 {offsets = [0, 24], sizes = [8, 8], strides = [1, 1]} : vector<8x32xbf16> to vector<8x8xbf16>
    %81 = vector.extract_strided_slice %18 {offsets = [0, 24], sizes = [8, 8], strides = [1, 1]} : vector<8x32xbf16> to vector<8x8xbf16>
    "tpu.trace_start"() <{level = 10 : i32, message = "qd,kd->qk"}> : () -> ()
    %cst_36 = arith.constant dense<0.000000e+00> : vector<8x8xf32>
    %82 = tpu.matmul %80, %81, %cst_36 {dimension_numbers = #tpu.dot_dimension_numbers<[1], [1], [0], [0], [0, 0, 1, 0], [], []>} : vector<8x8xbf16>, vector<8x8xbf16>, vector<8x8xf32> -> vector<8x8xf32>
    "tpu.trace_stop"() : () -> ()
    %cst_37 = arith.constant 0.353553385 : f32
    %83 = vector.broadcast %cst_37 : f32 to vector<8x8xf32>
    %84 = arith.mulf %82, %83 : vector<8x8xf32>
    %85 = arith.addf %84, %5 : vector<8x8xf32>
    %cst_38 = arith.constant dense<0xFF800000> : vector<8xf32>
    %86 = vector.multi_reduction <maximumf>, %85, %cst_38 [1] : vector<8x8xf32> to vector<8xf32>
    %87 = vector.shape_cast %86 : vector<8xf32> to vector<8x1xf32>
    %88 = vector.broadcast %87 : vector<8x1xf32> to vector<8x8xf32>
    %89 = arith.subf %85, %88 : vector<8x8xf32>
    %90 = math.exp %89 : vector<8x8xf32>
    %cst_39 = arith.constant dense<0.000000e+00> : vector<8xf32>
    %91 = vector.multi_reduction <add>, %90, %cst_39 [1] : vector<8x8xf32> to vector<8xf32>
    %92 = vector.shape_cast %91 : vector<8xf32> to vector<8x1xf32>
    %93 = tpu.reciprocal %92 {approx = true} : vector<8x1xf32> -> vector<8x1xf32>
    %94 = vector.broadcast %93 : vector<8x1xf32> to vector<8x8xf32>
    %95 = arith.mulf %90, %94 : vector<8x8xf32>
    %96 = arith.truncf %95 : vector<8x8xf32> to vector<8x8xbf16>
    %97 = vector.extract_strided_slice %19 {offsets = [0, 24], sizes = [8, 8], strides = [1, 1]} : vector<8x32xbf16> to vector<8x8xbf16>
    %cst_40 = arith.constant dense<0.000000e+00> : vector<8x8xf32>
    %98 = tpu.matmul %96, %97, %cst_40 {dimension_numbers = #tpu.dot_dimension_numbers<[1], [0], [0], [1], [0, 0, 1, 1], [], []>} : vector<8x8xbf16>, vector<8x8xbf16>, vector<8x8xf32> -> vector<8x8xf32>
    %c0_41 = arith.constant 0 : index
    %c24 = arith.constant 24 : index
    %99 = vector.load %arg27[%c0_41, %c24] : memref<8x32xf32, #tpu.memory_space<vmem>>, vector<8x8xf32>
    tpu.vector_store %arg27[%c0_41, %c24], %98 {strides = array<i32>} : memref<8x32xf32, #tpu.memory_space<vmem>>, vector<8x8xf32>,
    %c0_42 = arith.constant 0 : index
    %c0_43 = arith.constant 0 : index
    %100 = vector.load %arg27[%c0_42, %c0_43] : memref<8x32xf32, #tpu.memory_space<vmem>>, vector<8x32xf32>
    %101 = arith.truncf %100 : vector<8x32xf32> to vector<8x32xbf16>
    %c0_44 = arith.constant 0 : index
    %c0_45 = arith.constant 0 : index
    %102 = vector.load %arg7[%c0_44, %c0_45] : memref<32x32xbf16, #tpu.memory_space<vmem>>, vector<32x32xbf16>
    %cst_46 = arith.constant dense<0.000000e+00> : vector<8x32xf32>
    %103 = tpu.matmul %101, %102, %cst_46 {dimension_numbers = #tpu.dot_dimension_numbers<[1], [0], [0], [1], [0, 0, 1, 1], [], []>} : vector<8x32xbf16>, vector<32x32xbf16>, vector<8x32xf32> -> vector<8x32xf32>
    %c0_47 = arith.constant 0 : index
    %c0_48 = arith.constant 0 : index
    %104 = vector.load %arg8[%c0_47, %c0_48] : memref<1x32xf32, #tpu.memory_space<vmem>>, vector<1x32xf32>
    %105 = vector.broadcast %104 : vector<1x32xf32> to vector<8x32xf32>
    %106 = arith.addf %103, %105 : vector<8x32xf32>
    %107 = arith.addf %106, %1 : vector<8x32xf32>
    %cst_49 = arith.constant dense<0.000000e+00> : vector<8xf32>
    %108 = vector.multi_reduction <add>, %107, %cst_49 [1] : vector<8x32xf32> to vector<8xf32>
    %109 = vector.shape_cast %108 : vector<8xf32> to vector<8x1xf32>
    %cst_50 = arith.constant 3.200000e+01 : f32
    %110 = vector.broadcast %cst_50 : f32 to vector<8x1xf32>
    %111 = arith.divf %109, %110 : vector<8x1xf32>
    %112 = vector.broadcast %111 : vector<8x1xf32> to vector<8x32xf32>
    %113 = arith.subf %107, %112 : vector<8x32xf32>
    %114 = arith.mulf %113, %113 : vector<8x32xf32>
    %cst_51 = arith.constant dense<0.000000e+00> : vector<8xf32>
    %115 = vector.multi_reduction <add>, %114, %cst_51 [1] : vector<8x32xf32> to vector<8xf32>
    %116 = vector.shape_cast %115 : vector<8xf32> to vector<8x1xf32>
    %cst_52 = arith.constant 3.200000e+01 : f32
    %117 = vector.broadcast %cst_52 : f32 to vector<8x1xf32>
    %118 = arith.divf %116, %117 : vector<8x1xf32>
    %119 = vector.broadcast %111 : vector<8x1xf32> to vector<8x32xf32>
    %120 = arith.subf %107, %119 : vector<8x32xf32>
    %cst_53 = arith.constant 9.99999974E-6 : f32
    %121 = vector.broadcast %cst_53 : f32 to vector<8x1xf32>
    %122 = arith.addf %118, %121 : vector<8x1xf32>
    %123 = math.rsqrt %122 : vector<8x1xf32>
    %124 = vector.broadcast %123 : vector<8x1xf32> to vector<8x32xf32>
    %125 = arith.mulf %120, %124 : vector<8x32xf32>
    %c0_54 = arith.constant 0 : index
    %c0_55 = arith.constant 0 : index
    %126 = vector.load %arg9[%c0_54, %c0_55] : memref<1x32xf32, #tpu.memory_space<vmem>>, vector<1x32xf32>
    %127 = vector.broadcast %126 : vector<1x32xf32> to vector<8x32xf32>
    %128 = arith.mulf %125, %127 : vector<8x32xf32>
    %c0_56 = arith.constant 0 : index
    %c0_57 = arith.constant 0 : index
    %129 = vector.load %arg10[%c0_56, %c0_57] : memref<1x32xf32, #tpu.memory_space<vmem>>, vector<1x32xf32>
    %130 = vector.broadcast %129 : vector<1x32xf32> to vector<8x32xf32>
    %131 = arith.addf %128, %130 : vector<8x32xf32>
    %132 = arith.truncf %131 : vector<8x32xf32> to vector<8x32xbf16>
    %c0_58 = arith.constant 0 : index
    %c0_59 = arith.constant 0 : index
    %133 = vector.load %arg11[%c0_58, %c0_59] : memref<32x32xbf16, #tpu.memory_space<vmem>>, vector<32x32xbf16>
    %cst_60 = arith.constant dense<0.000000e+00> : vector<8x32xf32>
    %134 = tpu.matmul %132, %133, %cst_60 {dimension_numbers = #tpu.dot_dimension_numbers<[1], [0], [0], [1], [0, 0, 1, 1], [], []>} : vector<8x32xbf16>, vector<32x32xbf16>, vector<8x32xf32> -> vector<8x32xf32>
    %c0_61 = arith.constant 0 : index
    %c0_62 = arith.constant 0 : index
    %135 = vector.load %arg12[%c0_61, %c0_62] : memref<1x32xf32, #tpu.memory_space<vmem>>, vector<1x32xf32>
    %136 = vector.broadcast %135 : vector<1x32xf32> to vector<8x32xf32>
    %137 = arith.addf %134, %136 : vector<8x32xf32>
    %138 = arith.truncf %3 : vector<8x32xf32> to vector<8x32xbf16>
    %c0_63 = arith.constant 0 : index
    %c0_64 = arith.constant 0 : index
    %139 = vector.load %arg13[%c0_63, %c0_64] : memref<32x64xbf16, #tpu.memory_space<vmem>>, vector<32x64xbf16>
    %cst_65 = arith.constant dense<0.000000e+00> : vector<8x64xf32>
    %140 = tpu.matmul %138, %139, %cst_65 {dimension_numbers = #tpu.dot_dimension_numbers<[1], [0], [0], [1], [0, 0, 1, 1], [], []>} : vector<8x32xbf16>, vector<32x64xbf16>, vector<8x64xf32> -> vector<8x64xf32>
    %c0_66 = arith.constant 0 : index
    %c0_67 = arith.constant 0 : index
    %141 = vector.load %arg14[%c0_66, %c0_67] : memref<1x64xf32, #tpu.memory_space<vmem>>, vector<1x64xf32>
    %142 = vector.broadcast %141 : vector<1x64xf32> to vector<8x64xf32>
    %143 = arith.addf %140, %142 : vector<8x64xf32>
    %144 = vector.extract_strided_slice %143 {offsets = [0, 0], sizes = [8, 32], strides = [1, 1]} : vector<8x64xf32> to vector<8x32xf32>
    %145 = vector.extract_strided_slice %143 {offsets = [0, 32], sizes = [8, 32], strides = [1, 1]} : vector<8x64xf32> to vector<8x32xf32>
    %146 = arith.truncf %137 : vector<8x32xf32> to vector<8x32xbf16>
    %147 = arith.truncf %144 : vector<8x32xf32> to vector<8x32xbf16>
    %148 = arith.truncf %145 : vector<8x32xf32> to vector<8x32xbf16>
    %149 = vector.extract_strided_slice %146 {offsets = [0, 0], sizes = [8, 8], strides = [1, 1]} : vector<8x32xbf16> to vector<8x8xbf16>
    %150 = vector.extract_strided_slice %147 {offsets = [0, 0], sizes = [8, 8], strides = [1, 1]} : vector<8x32xbf16> to vector<8x8xbf16>
    "tpu.trace_start"() <{level = 10 : i32, message = "qd,kd->qk"}> : () -> ()
    %cst_68 = arith.constant dense<0.000000e+00> : vector<8x8xf32>
    %151 = tpu.matmul %149, %150, %cst_68 {dimension_numbers = #tpu.dot_dimension_numbers<[1], [1], [0], [0], [0, 0, 1, 0], [], []>} : vector<8x8xbf16>, vector<8x8xbf16>, vector<8x8xf32> -> vector<8x8xf32>
    "tpu.trace_stop"() : () -> ()
    %cst_69 = arith.constant 0.353553385 : f32
    %152 = vector.broadcast %cst_69 : f32 to vector<8x8xf32>
    %153 = arith.mulf %151, %152 : vector<8x8xf32>
    %154 = arith.addf %153, %7 : vector<8x8xf32>
    %cst_70 = arith.constant dense<0xFF800000> : vector<8xf32>
    %155 = vector.multi_reduction <maximumf>, %154, %cst_70 [1] : vector<8x8xf32> to vector<8xf32>
    %156 = vector.shape_cast %155 : vector<8xf32> to vector<8x1xf32>
    %157 = vector.broadcast %156 : vector<8x1xf32> to vector<8x8xf32>
    %158 = arith.subf %154, %157 : vector<8x8xf32>
    %159 = math.exp %158 : vector<8x8xf32>
    %cst_71 = arith.constant dense<0.000000e+00> : vector<8xf32>
    %160 = vector.multi_reduction <add>, %159, %cst_71 [1] : vector<8x8xf32> to vector<8xf32>
    %161 = vector.shape_cast %160 : vector<8xf32> to vector<8x1xf32>
    %162 = vector.broadcast %161 : vector<8x1xf32> to vector<8x8xf32>
    %163 = arith.divf %159, %162 : vector<8x8xf32>
    %c0_72 = arith.constant 0 : index
    %c0_73 = arith.constant 0 : index
    %c0_74 = arith.constant 0 : index
    %c0_75 = arith.constant 0 : index
    %164 = vector.load %arg26[%c0_72, %c0_73, %c0_74, %c0_75] : memref<1x4x8x8xf32, #tpu.memory_space<vmem>>, vector<1x1x8x8xf32>
    %165 = vector.shape_cast %164 : vector<1x1x8x8xf32> to vector<8x8xf32>
    %166 = vector.shape_cast %163 : vector<8x8xf32> to vector<1x1x8x8xf32>
    tpu.vector_store %arg26[%c0_72, %c0_73, %c0_74, %c0_75], %166 {strides = array<i32>} : memref<1x4x8x8xf32, #tpu.memory_space<vmem>>, vector<1x1x8x8xf32>,
    %167 = arith.truncf %163 : vector<8x8xf32> to vector<8x8xbf16>
    %168 = vector.extract_strided_slice %148 {offsets = [0, 0], sizes = [8, 8], strides = [1, 1]} : vector<8x32xbf16> to vector<8x8xbf16>
    %cst_76 = arith.constant dense<0.000000e+00> : vector<8x8xf32>
    %169 = tpu.matmul %167, %168, %cst_76 {dimension_numbers = #tpu.dot_dimension_numbers<[1], [0], [0], [1], [0, 0, 1, 1], [], []>} : vector<8x8xbf16>, vector<8x8xbf16>, vector<8x8xf32> -> vector<8x8xf32>
    %c0_77 = arith.constant 0 : index
    %c0_78 = arith.constant 0 : index
    %170 = vector.load %arg27[%c0_77, %c0_78] : memref<8x32xf32, #tpu.memory_space<vmem>>, vector<8x8xf32>
    tpu.vector_store %arg27[%c0_77, %c0_78], %169 {strides = array<i32>} : memref<8x32xf32, #tpu.memory_space<vmem>>, vector<8x8xf32>,
    %171 = vector.extract_strided_slice %146 {offsets = [0, 8], sizes = [8, 8], strides = [1, 1]} : vector<8x32xbf16> to vector<8x8xbf16>
    %172 = vector.extract_strided_slice %147 {offsets = [0, 8], sizes = [8, 8], strides = [1, 1]} : vector<8x32xbf16> to vector<8x8xbf16>
    "tpu.trace_start"() <{level = 10 : i32, message = "qd,kd->qk"}> : () -> ()
    %cst_79 = arith.constant dense<0.000000e+00> : vector<8x8xf32>
    %173 = tpu.matmul %171, %172, %cst_79 {dimension_numbers = #tpu.dot_dimension_numbers<[1], [1], [0], [0], [0, 0, 1, 0], [], []>} : vector<8x8xbf16>, vector<8x8xbf16>, vector<8x8xf32> -> vector<8x8xf32>
    "tpu.trace_stop"() : () -> ()
    %cst_80 = arith.constant 0.353553385 : f32
    %174 = vector.broadcast %cst_80 : f32 to vector<8x8xf32>
    %175 = arith.mulf %173, %174 : vector<8x8xf32>
    %176 = arith.addf %175, %7 : vector<8x8xf32>
    %cst_81 = arith.constant dense<0xFF800000> : vector<8xf32>
    %177 = vector.multi_reduction <maximumf>, %176, %cst_81 [1] : vector<8x8xf32> to vector<8xf32>
    %178 = vector.shape_cast %177 : vector<8xf32> to vector<8x1xf32>
    %179 = vector.broadcast %178 : vector<8x1xf32> to vector<8x8xf32>
    %180 = arith.subf %176, %179 : vector<8x8xf32>
    %181 = math.exp %180 : vector<8x8xf32>
    %cst_82 = arith.constant dense<0.000000e+00> : vector<8xf32>
    %182 = vector.multi_reduction <add>, %181, %cst_82 [1] : vector<8x8xf32> to vector<8xf32>
    %183 = vector.shape_cast %182 : vector<8xf32> to vector<8x1xf32>
    %184 = vector.broadcast %183 : vector<8x1xf32> to vector<8x8xf32>
    %185 = arith.divf %181, %184 : vector<8x8xf32>
    %c0_83 = arith.constant 0 : index
    %c1 = arith.constant 1 : index
    %c0_84 = arith.constant 0 : index
    %c0_85 = arith.constant 0 : index
    %186 = vector.load %arg26[%c0_83, %c1, %c0_84, %c0_85] : memref<1x4x8x8xf32, #tpu.memory_space<vmem>>, vector<1x1x8x8xf32>
    %187 = vector.shape_cast %186 : vector<1x1x8x8xf32> to vector<8x8xf32>
    %188 = vector.shape_cast %185 : vector<8x8xf32> to vector<1x1x8x8xf32>
    tpu.vector_store %arg26[%c0_83, %c1, %c0_84, %c0_85], %188 {strides = array<i32>} : memref<1x4x8x8xf32, #tpu.memory_space<vmem>>, vector<1x1x8x8xf32>,
    %189 = arith.truncf %185 : vector<8x8xf32> to vector<8x8xbf16>
    %190 = vector.extract_strided_slice %148 {offsets = [0, 8], sizes = [8, 8], strides = [1, 1]} : vector<8x32xbf16> to vector<8x8xbf16>
    %cst_86 = arith.constant dense<0.000000e+00> : vector<8x8xf32>
    %191 = tpu.matmul %189, %190, %cst_86 {dimension_numbers = #tpu.dot_dimension_numbers<[1], [0], [0], [1], [0, 0, 1, 1], [], []>} : vector<8x8xbf16>, vector<8x8xbf16>, vector<8x8xf32> -> vector<8x8xf32>
    %c0_87 = arith.constant 0 : index
    %c8_88 = arith.constant 8 : index
    %192 = vector.load %arg27[%c0_87, %c8_88] : memref<8x32xf32, #tpu.memory_space<vmem>>, vector<8x8xf32>
    tpu.vector_store %arg27[%c0_87, %c8_88], %191 {strides = array<i32>} : memref<8x32xf32, #tpu.memory_space<vmem>>, vector<8x8xf32>,
    %193 = vector.extract_strided_slice %146 {offsets = [0, 16], sizes = [8, 8], strides = [1, 1]} : vector<8x32xbf16> to vector<8x8xbf16>
    %194 = vector.extract_strided_slice %147 {offsets = [0, 16], sizes = [8, 8], strides = [1, 1]} : vector<8x32xbf16> to vector<8x8xbf16>
    "tpu.trace_start"() <{level = 10 : i32, message = "qd,kd->qk"}> : () -> ()
    %cst_89 = arith.constant dense<0.000000e+00> : vector<8x8xf32>
    %195 = tpu.matmul %193, %194, %cst_89 {dimension_numbers = #tpu.dot_dimension_numbers<[1], [1], [0], [0], [0, 0, 1, 0], [], []>} : vector<8x8xbf16>, vector<8x8xbf16>, vector<8x8xf32> -> vector<8x8xf32>
    "tpu.trace_stop"() : () -> ()
    %cst_90 = arith.constant 0.353553385 : f32
    %196 = vector.broadcast %cst_90 : f32 to vector<8x8xf32>
    %197 = arith.mulf %195, %196 : vector<8x8xf32>
    %198 = arith.addf %197, %7 : vector<8x8xf32>
    %cst_91 = arith.constant dense<0xFF800000> : vector<8xf32>
    %199 = vector.multi_reduction <maximumf>, %198, %cst_91 [1] : vector<8x8xf32> to vector<8xf32>
    %200 = vector.shape_cast %199 : vector<8xf32> to vector<8x1xf32>
    %201 = vector.broadcast %200 : vector<8x1xf32> to vector<8x8xf32>
    %202 = arith.subf %198, %201 : vector<8x8xf32>
    %203 = math.exp %202 : vector<8x8xf32>
    %cst_92 = arith.constant dense<0.000000e+00> : vector<8xf32>
    %204 = vector.multi_reduction <add>, %203, %cst_92 [1] : vector<8x8xf32> to vector<8xf32>
    %205 = vector.shape_cast %204 : vector<8xf32> to vector<8x1xf32>
    %206 = vector.broadcast %205 : vector<8x1xf32> to vector<8x8xf32>
    %207 = arith.divf %203, %206 : vector<8x8xf32>
    %c0_93 = arith.constant 0 : index
    %c2 = arith.constant 2 : index
    %c0_94 = arith.constant 0 : index
    %c0_95 = arith.constant 0 : index
    %208 = vector.load %arg26[%c0_93, %c2, %c0_94, %c0_95] : memref<1x4x8x8xf32, #tpu.memory_space<vmem>>, vector<1x1x8x8xf32>
    %209 = vector.shape_cast %208 : vector<1x1x8x8xf32> to vector<8x8xf32>
    %210 = vector.shape_cast %207 : vector<8x8xf32> to vector<1x1x8x8xf32>
    tpu.vector_store %arg26[%c0_93, %c2, %c0_94, %c0_95], %210 {strides = array<i32>} : memref<1x4x8x8xf32, #tpu.memory_space<vmem>>, vector<1x1x8x8xf32>,
    %211 = arith.truncf %207 : vector<8x8xf32> to vector<8x8xbf16>
    %212 = vector.extract_strided_slice %148 {offsets = [0, 16], sizes = [8, 8], strides = [1, 1]} : vector<8x32xbf16> to vector<8x8xbf16>
    %cst_96 = arith.constant dense<0.000000e+00> : vector<8x8xf32>
    %213 = tpu.matmul %211, %212, %cst_96 {dimension_numbers = #tpu.dot_dimension_numbers<[1], [0], [0], [1], [0, 0, 1, 1], [], []>} : vector<8x8xbf16>, vector<8x8xbf16>, vector<8x8xf32> -> vector<8x8xf32>
    %c0_97 = arith.constant 0 : index
    %c16_98 = arith.constant 16 : index
    %214 = vector.load %arg27[%c0_97, %c16_98] : memref<8x32xf32, #tpu.memory_space<vmem>>, vector<8x8xf32>
    tpu.vector_store %arg27[%c0_97, %c16_98], %213 {strides = array<i32>} : memref<8x32xf32, #tpu.memory_space<vmem>>, vector<8x8xf32>,
    %215 = vector.extract_strided_slice %146 {offsets = [0, 24], sizes = [8, 8], strides = [1, 1]} : vector<8x32xbf16> to vector<8x8xbf16>
    %216 = vector.extract_strided_slice %147 {offsets = [0, 24], sizes = [8, 8], strides = [1, 1]} : vector<8x32xbf16> to vector<8x8xbf16>
    "tpu.trace_start"() <{level = 10 : i32, message = "qd,kd->qk"}> : () -> ()
    %cst_99 = arith.constant dense<0.000000e+00> : vector<8x8xf32>
    %217 = tpu.matmul %215, %216, %cst_99 {dimension_numbers = #tpu.dot_dimension_numbers<[1], [1], [0], [0], [0, 0, 1, 0], [], []>} : vector<8x8xbf16>, vector<8x8xbf16>, vector<8x8xf32> -> vector<8x8xf32>
    "tpu.trace_stop"() : () -> ()
    %cst_100 = arith.constant 0.353553385 : f32
    %218 = vector.broadcast %cst_100 : f32 to vector<8x8xf32>
    %219 = arith.mulf %217, %218 : vector<8x8xf32>
    %220 = arith.addf %219, %7 : vector<8x8xf32>
    %cst_101 = arith.constant dense<0xFF800000> : vector<8xf32>
    %221 = vector.multi_reduction <maximumf>, %220, %cst_101 [1] : vector<8x8xf32> to vector<8xf32>
    %222 = vector.shape_cast %221 : vector<8xf32> to vector<8x1xf32>
    %223 = vector.broadcast %222 : vector<8x1xf32> to vector<8x8xf32>
    %224 = arith.subf %220, %223 : vector<8x8xf32>
    %225 = math.exp %224 : vector<8x8xf32>
    %cst_102 = arith.constant dense<0.000000e+00> : vector<8xf32>
    %226 = vector.multi_reduction <add>, %225, %cst_102 [1] : vector<8x8xf32> to vector<8xf32>
    %227 = vector.shape_cast %226 : vector<8xf32> to vector<8x1xf32>
    %228 = vector.broadcast %227 : vector<8x1xf32> to vector<8x8xf32>
    %229 = arith.divf %225, %228 : vector<8x8xf32>
    %c0_103 = arith.constant 0 : index
    %c3 = arith.constant 3 : index
    %c0_104 = arith.constant 0 : index
    %c0_105 = arith.constant 0 : index
    %230 = vector.load %arg26[%c0_103, %c3, %c0_104, %c0_105] : memref<1x4x8x8xf32, #tpu.memory_space<vmem>>, vector<1x1x8x8xf32>
    %231 = vector.shape_cast %230 : vector<1x1x8x8xf32> to vector<8x8xf32>
    %232 = vector.shape_cast %229 : vector<8x8xf32> to vector<1x1x8x8xf32>
    tpu.vector_store %arg26[%c0_103, %c3, %c0_104, %c0_105], %232 {strides = array<i32>} : memref<1x4x8x8xf32, #tpu.memory_space<vmem>>, vector<1x1x8x8xf32>,
    %233 = arith.truncf %229 : vector<8x8xf32> to vector<8x8xbf16>
    %234 = vector.extract_strided_slice %148 {offsets = [0, 24], sizes = [8, 8], strides = [1, 1]} : vector<8x32xbf16> to vector<8x8xbf16>
    %cst_106 = arith.constant dense<0.000000e+00> : vector<8x8xf32>
    %235 = tpu.matmul %233, %234, %cst_106 {dimension_numbers = #tpu.dot_dimension_numbers<[1], [0], [0], [1], [0, 0, 1, 1], [], []>} : vector<8x8xbf16>, vector<8x8xbf16>, vector<8x8xf32> -> vector<8x8xf32>
    %c0_107 = arith.constant 0 : index
    %c24_108 = arith.constant 24 : index
    %236 = vector.load %arg27[%c0_107, %c24_108] : memref<8x32xf32, #tpu.memory_space<vmem>>, vector<8x8xf32>
    tpu.vector_store %arg27[%c0_107, %c24_108], %235 {strides = array<i32>} : memref<8x32xf32, #tpu.memory_space<vmem>>, vector<8x8xf32>,
    %c0_109 = arith.constant 0 : index
    %c0_110 = arith.constant 0 : index
    %237 = vector.load %arg27[%c0_109, %c0_110] : memref<8x32xf32, #tpu.memory_space<vmem>>, vector<8x32xf32>
    %238 = arith.truncf %237 : vector<8x32xf32> to vector<8x32xbf16>
    %c0_111 = arith.constant 0 : index
    %c0_112 = arith.constant 0 : index
    %239 = vector.load %arg15[%c0_111, %c0_112] : memref<32x32xbf16, #tpu.memory_space<vmem>>, vector<32x32xbf16>
    %cst_113 = arith.constant dense<0.000000e+00> : vector<8x32xf32>
    %240 = tpu.matmul %238, %239, %cst_113 {dimension_numbers = #tpu.dot_dimension_numbers<[1], [0], [0], [1], [0, 0, 1, 1], [], []>} : vector<8x32xbf16>, vector<32x32xbf16>, vector<8x32xf32> -> vector<8x32xf32>
    %c0_114 = arith.constant 0 : index
    %c0_115 = arith.constant 0 : index
    %241 = vector.load %arg16[%c0_114, %c0_115] : memref<1x32xf32, #tpu.memory_space<vmem>>, vector<1x32xf32>
    %242 = vector.broadcast %241 : vector<1x32xf32> to vector<8x32xf32>
    %243 = arith.addf %240, %242 : vector<8x32xf32>
    %244 = arith.addf %243, %131 : vector<8x32xf32>
    %cst_116 = arith.constant dense<0.000000e+00> : vector<8xf32>
    %245 = vector.multi_reduction <add>, %244, %cst_116 [1] : vector<8x32xf32> to vector<8xf32>
    %246 = vector.shape_cast %245 : vector<8xf32> to vector<8x1xf32>
    %cst_117 = arith.constant 3.200000e+01 : f32
    %247 = vector.broadcast %cst_117 : f32 to vector<8x1xf32>
    %248 = arith.divf %246, %247 : vector<8x1xf32>
    %249 = vector.broadcast %248 : vector<8x1xf32> to vector<8x32xf32>
    %250 = arith.subf %244, %249 : vector<8x32xf32>
    %251 = arith.mulf %250, %250 : vector<8x32xf32>
    %cst_118 = arith.constant dense<0.000000e+00> : vector<8xf32>
    %252 = vector.multi_reduction <add>, %251, %cst_118 [1] : vector<8x32xf32> to vector<8xf32>
    %253 = vector.shape_cast %252 : vector<8xf32> to vector<8x1xf32>
    %cst_119 = arith.constant 3.200000e+01 : f32
    %254 = vector.broadcast %cst_119 : f32 to vector<8x1xf32>
    %255 = arith.divf %253, %254 : vector<8x1xf32>
    %256 = vector.broadcast %248 : vector<8x1xf32> to vector<8x32xf32>
    %257 = arith.subf %244, %256 : vector<8x32xf32>
    %cst_120 = arith.constant 9.99999974E-6 : f32
    %258 = vector.broadcast %cst_120 : f32 to vector<8x1xf32>
    %259 = arith.addf %255, %258 : vector<8x1xf32>
    %260 = math.rsqrt %259 : vector<8x1xf32>
    %261 = vector.broadcast %260 : vector<8x1xf32> to vector<8x32xf32>
    %262 = arith.mulf %257, %261 : vector<8x32xf32>
    %c0_121 = arith.constant 0 : index
    %c0_122 = arith.constant 0 : index
    %263 = vector.load %arg17[%c0_121, %c0_122] : memref<1x32xf32, #tpu.memory_space<vmem>>, vector<1x32xf32>
    %264 = vector.broadcast %263 : vector<1x32xf32> to vector<8x32xf32>
    %265 = arith.mulf %262, %264 : vector<8x32xf32>
    %c0_123 = arith.constant 0 : index
    %c0_124 = arith.constant 0 : index
    %266 = vector.load %arg18[%c0_123, %c0_124] : memref<1x32xf32, #tpu.memory_space<vmem>>, vector<1x32xf32>
    %267 = vector.broadcast %266 : vector<1x32xf32> to vector<8x32xf32>
    %268 = arith.addf %265, %267 : vector<8x32xf32>
    %269 = arith.truncf %268 : vector<8x32xf32> to vector<8x32xbf16>
    %c0_125 = arith.constant 0 : index
    %c0_126 = arith.constant 0 : index
    %270 = vector.load %arg19[%c0_125, %c0_126] : memref<32x64xbf16, #tpu.memory_space<vmem>>, vector<32x64xbf16>
    %cst_127 = arith.constant dense<0.000000e+00> : vector<8x64xf32>
    %271 = tpu.matmul %269, %270, %cst_127 {dimension_numbers = #tpu.dot_dimension_numbers<[1], [0], [0], [1], [0, 0, 1, 1], [], []>} : vector<8x32xbf16>, vector<32x64xbf16>, vector<8x64xf32> -> vector<8x64xf32>
    %c0_128 = arith.constant 0 : index
    %c0_129 = arith.constant 0 : index
    %272 = vector.load %arg20[%c0_128, %c0_129] : memref<1x64xf32, #tpu.memory_space<vmem>>, vector<1x64xf32>
    %273 = vector.broadcast %272 : vector<1x64xf32> to vector<8x64xf32>
    %274 = arith.addf %271, %273 : vector<8x64xf32>
    %cst_130 = arith.constant 0.000000e+00 : f32
    %275 = vector.broadcast %cst_130 : f32 to vector<8x64xf32>
    %276 = arith.maximumf %274, %275 : vector<8x64xf32>
    %277 = arith.truncf %276 : vector<8x64xf32> to vector<8x64xbf16>
    %c0_131 = arith.constant 0 : index
    %c0_132 = arith.constant 0 : index
    %278 = vector.load %arg21[%c0_131, %c0_132] : memref<64x32xbf16, #tpu.memory_space<vmem>>, vector<64x32xbf16>
    %cst_133 = arith.constant dense<0.000000e+00> : vector<8x32xf32>
    %279 = tpu.matmul %277, %278, %cst_133 {dimension_numbers = #tpu.dot_dimension_numbers<[1], [0], [0], [1], [0, 0, 1, 1], [], []>} : vector<8x64xbf16>, vector<64x32xbf16>, vector<8x32xf32> -> vector<8x32xf32>
    %c0_134 = arith.constant 0 : index
    %c0_135 = arith.constant 0 : index
    %280 = vector.load %arg22[%c0_134, %c0_135] : memref<1x32xf32, #tpu.memory_space<vmem>>, vector<1x32xf32>
    %281 = vector.broadcast %280 : vector<1x32xf32> to vector<8x32xf32>
    %282 = arith.addf %279, %281 : vector<8x32xf32>
    %283 = arith.addf %282, %268 : vector<8x32xf32>
    %cst_136 = arith.constant dense<0.000000e+00> : vector<8xf32>
    %284 = vector.multi_reduction <add>, %283, %cst_136 [1] : vector<8x32xf32> to vector<8xf32>
    %285 = vector.shape_cast %284 : vector<8xf32> to vector<8x1xf32>
    %cst_137 = arith.constant 3.200000e+01 : f32
    %286 = vector.broadcast %cst_137 : f32 to vector<8x1xf32>
    %287 = arith.divf %285, %286 : vector<8x1xf32>
    %288 = vector.broadcast %287 : vector<8x1xf32> to vector<8x32xf32>
    %289 = arith.subf %283, %288 : vector<8x32xf32>
    %290 = arith.mulf %289, %289 : vector<8x32xf32>
    %cst_138 = arith.constant dense<0.000000e+00> : vector<8xf32>
    %291 = vector.multi_reduction <add>, %290, %cst_138 [1] : vector<8x32xf32> to vector<8xf32>
    %292 = vector.shape_cast %291 : vector<8xf32> to vector<8x1xf32>
    %cst_139 = arith.constant 3.200000e+01 : f32
    %293 = vector.broadcast %cst_139 : f32 to vector<8x1xf32>
    %294 = arith.divf %292, %293 : vector<8x1xf32>
    %295 = vector.broadcast %287 : vector<8x1xf32> to vector<8x32xf32>
    %296 = arith.subf %283, %295 : vector<8x32xf32>
    %cst_140 = arith.constant 9.99999974E-6 : f32
    %297 = vector.broadcast %cst_140 : f32 to vector<8x1xf32>
    %298 = arith.addf %294, %297 : vector<8x1xf32>
    %299 = math.rsqrt %298 : vector<8x1xf32>
    %300 = vector.broadcast %299 : vector<8x1xf32> to vector<8x32xf32>
    %301 = arith.mulf %296, %300 : vector<8x32xf32>
    %c0_141 = arith.constant 0 : index
    %c0_142 = arith.constant 0 : index
    %302 = vector.load %arg23[%c0_141, %c0_142] : memref<1x32xf32, #tpu.memory_space<vmem>>, vector<1x32xf32>
    %303 = vector.broadcast %302 : vector<1x32xf32> to vector<8x32xf32>
    %304 = arith.mulf %301, %303 : vector<8x32xf32>
    %c0_143 = arith.constant 0 : index
    %c0_144 = arith.constant 0 : index
    %305 = vector.load %arg24[%c0_143, %c0_144] : memref<1x32xf32, #tpu.memory_space<vmem>>, vector<1x32xf32>
    %306 = vector.broadcast %305 : vector<1x32xf32> to vector<8x32xf32>
    %307 = arith.addf %304, %306 : vector<8x32xf32>
    %c0_145 = arith.constant 0 : index
    %c0_146 = arith.constant 0 : index
    %c0_147 = arith.constant 0 : index
    %308 = vector.load %arg25[%c0_145, %c0_146, %c0_147] : memref<1x8x32xf32, #tpu.memory_space<vmem>>, vector<1x8x32xf32>
    %309 = vector.shape_cast %308 : vector<1x8x32xf32> to vector<8x32xf32>
    %310 = vector.shape_cast %307 : vector<8x32xf32> to vector<1x8x32xf32>
    tpu.vector_store %arg25[%c0_145, %c0_146, %c0_147], %310 {strides = array<i32>} : memref<1x8x32xf32, #tpu.memory_space<vmem>>, vector<1x8x32xf32>,
    return
  }
  func.func @transform_0(%arg0: i32) -> (i32, i32, i32) {
    %c0_i32 = arith.constant 0 : i32
    %c0_i32_0 = arith.constant 0 : i32
    %c0_i32_1 = arith.constant 0 : i32
    return %arg0, %c0_i32, %c0_i32_0 : i32, i32, i32
  }
  func.func @transform_1(%arg0: i32) -> (i32, i32, i32) {
    %c0_i32 = arith.constant 0 : i32
    %c0_i32_0 = arith.constant 0 : i32
    %c0_i32_1 = arith.constant 0 : i32
    return %arg0, %c0_i32, %c0_i32_0 : i32, i32, i32
  }
  func.func @transform_2(%arg0: i32) -> (i32, i32, i32, i32) {
    %c0_i32 = arith.constant 0 : i32
    %c0_i32_0 = arith.constant 0 : i32
    %c0_i32_1 = arith.constant 0 : i32
    %c0_i32_2 = arith.constant 0 : i32
    return %arg0, %c0_i32, %c0_i32_0, %c0_i32_1 : i32, i32, i32, i32
  }
  func.func @transform_3(%arg0: i32) -> (i32, i32, i32, i32) {
    %c0_i32 = arith.constant 0 : i32
    %c0_i32_0 = arith.constant 0 : i32
    %c0_i32_1 = arith.constant 0 : i32
    %c0_i32_2 = arith.constant 0 : i32
    return %arg0, %c0_i32, %c0_i32_0, %c0_i32_1 : i32, i32, i32, i32
  }
  func.func @transform_4(%arg0: i32) -> (i32, i32) {
    %c0_i32 = arith.constant 0 : i32
    %c0_i32_0 = arith.constant 0 : i32
    %c0_i32_1 = arith.constant 0 : i32
    return %c0_i32, %c0_i32_0 : i32, i32
  }
  func.func @transform_5(%arg0: i32) -> (i32, i32) {
    %c0_i32 = arith.constant 0 : i32
    %c0_i32_0 = arith.constant 0 : i32
    %c0_i32_1 = arith.constant 0 : i32
    return %c0_i32, %c0_i32_0 : i32, i32
  }
  func.func @transform_6(%arg0: i32) -> (i32, i32) {
    %c0_i32 = arith.constant 0 : i32
    %c0_i32_0 = arith.constant 0 : i32
    %c0_i32_1 = arith.constant 0 : i32
    return %c0_i32, %c0_i32_0 : i32, i32
  }
  func.func @transform_7(%arg0: i32) -> (i32, i32) {
    %c0_i32 = arith.constant 0 : i32
    %c0_i32_0 = arith.constant 0 : i32
    %c0_i32_1 = arith.constant 0 : i32
    return %c0_i32, %c0_i32_0 : i32, i32
  }
  func.func @transform_8(%arg0: i32) -> (i32, i32) {
    %c0_i32 = arith.constant 0 : i32
    %c0_i32_0 = arith.constant 0 : i32
    %c0_i32_1 = arith.constant 0 : i32
    return %c0_i32, %c0_i32_0 : i32, i32
  }
  func.func @transform_9(%arg0: i32) -> (i32, i32) {
    %c0_i32 = arith.constant 0 : i32
    %c0_i32_0 = arith.constant 0 : i32
    %c0_i32_1 = arith.constant 0 : i32
    return %c0_i32, %c0_i32_0 : i32, i32
  }
  func.func @transform_10(%arg0: i32) -> (i32, i32) {
    %c0_i32 = arith.constant 0 : i32
    %c0_i32_0 = arith.constant 0 : i32
    %c0_i32_1 = arith.constant 0 : i32
    return %c0_i32, %c0_i32_0 : i32, i32
  }
  func.func @transform_11(%arg0: i32) -> (i32, i32) {
    %c0_i32 = arith.constant 0 : i32
    %c0_i32_0 = arith.constant 0 : i32
    %c0_i32_1 = arith.constant 0 : i32
    return %c0_i32, %c0_i32_0 : i32, i32
  }
  func.func @transform_12(%arg0: i32) -> (i32, i32) {
    %c0_i32 = arith.constant 0 : i32
    %c0_i32_0 = arith.constant 0 : i32
    %c0_i32_1 = arith.constant 0 : i32
    return %c0_i32, %c0_i32_0 : i32, i32
  }
  func.func @transform_13(%arg0: i32) -> (i32, i32) {
    %c0_i32 = arith.constant 0 : i32
    %c0_i32_0 = arith.constant 0 : i32
    %c0_i32_1 = arith.constant 0 : i32
    return %c0_i32, %c0_i32_0 : i32, i32
  }
  func.func @transform_14(%arg0: i32) -> (i32, i32) {
    %c0_i32 = arith.constant 0 : i32
    %c0_i32_0 = arith.constant 0 : i32
    %c0_i32_1 = arith.constant 0 : i32
    return %c0_i32, %c0_i32_0 : i32, i32
  }
  func.func @transform_15(%arg0: i32) -> (i32, i32) {
    %c0_i32 = arith.constant 0 : i32
    %c0_i32_0 = arith.constant 0 : i32
    %c0_i32_1 = arith.constant 0 : i32
    return %c0_i32, %c0_i32_0 : i32, i32
  }
  func.func @transform_16(%arg0: i32) -> (i32, i32) {
    %c0_i32 = arith.constant 0 : i32
    %c0_i32_0 = arith.constant 0 : i32
    %c0_i32_1 = arith.constant 0 : i32
    return %c0_i32, %c0_i32_0 : i32, i32
  }
  func.func @transform_17(%arg0: i32) -> (i32, i32) {
    %c0_i32 = arith.constant 0 : i32
    %c0_i32_0 = arith.constant 0 : i32
    %c0_i32_1 = arith.constant 0 : i32
    return %c0_i32, %c0_i32_0 : i32, i32
  }
  func.func @transform_18(%arg0: i32) -> (i32, i32) {
    %c0_i32 = arith.constant 0 : i32
    %c0_i32_0 = arith.constant 0 : i32
    %c0_i32_1 = arith.constant 0 : i32
    return %c0_i32, %c0_i32_0 : i32, i32
  }
  func.func @transform_19(%arg0: i32) -> (i32, i32) {
    %c0_i32 = arith.constant 0 : i32
    %c0_i32_0 = arith.constant 0 : i32
    %c0_i32_1 = arith.constant 0 : i32
    return %c0_i32, %c0_i32_0 : i32, i32
  }
  func.func @transform_20(%arg0: i32) -> (i32, i32) {
    %c0_i32 = arith.constant 0 : i32
    %c0_i32_0 = arith.constant 0 : i32
    %c0_i32_1 = arith.constant 0 : i32
    return %c0_i32, %c0_i32_0 : i32, i32
  }
  func.func @transform_21(%arg0: i32) -> (i32, i32) {
    %c0_i32 = arith.constant 0 : i32
    %c0_i32_0 = arith.constant 0 : i32
    %c0_i32_1 = arith.constant 0 : i32
    return %c0_i32, %c0_i32_0 : i32, i32
  }
  func.func @transform_22(%arg0: i32) -> (i32, i32) {
    %c0_i32 = arith.constant 0 : i32
    %c0_i32_0 = arith.constant 0 : i32
    %c0_i32_1 = arith.constant 0 : i32
    return %c0_i32, %c0_i32_0 : i32, i32
  }
  func.func @transform_23(%arg0: i32) -> (i32, i32) {
    %c0_i32 = arith.constant 0 : i32
    %c0_i32_0 = arith.constant 0 : i32
    %c0_i32_1 = arith.constant 0 : i32
    return %c0_i32, %c0_i32_0 : i32, i32
  }
  func.func @transform_24(%arg0: i32) -> (i32, i32, i32) {
    %c0_i32 = arith.constant 0 : i32
    %c0_i32_0 = arith.constant 0 : i32
    %c0_i32_1 = arith.constant 0 : i32
    return %arg0, %c0_i32, %c0_i32_0 : i32, i32, i32
  }
  func.func @transform_25(%arg0: i32) -> (i32, i32, i32, i32) {
    %c0_i32 = arith.constant 0 : i32
    %c0_i32_0 = arith.constant 0 : i32
    %c0_i32_1 = arith.constant 0 : i32
    %c0_i32_2 = arith.constant 0 : i32
    return %arg0, %c0_i32, %c0_i32_0, %c0_i32_1 : i32, i32, i32, i32
  }
}

</mosaic_0001>

<bundles_post_ra>
// kernel: decoder_block_forward.1
= control target key start
LH: loop header
LB: loop body
LE: loop exit
PB: predicated region body
PF: predicated region fallthrough
CT: control target
= control target key end

     0   :  { %s4327_s0 = inlined_call_operand.vmem [shape: f32[2,8,32], index: 0, kind: input, shape index: {}]   ;;  %s4328_s1 = inlined_call_operand.vmem [shape: f32[2,8,32], index: 1, kind: input, shape index: {}]   ;;  %s4329_s2 = inlined_call_operand.vmem [shape: f32[2,1,8,8], index: 2, kind: input, shape index: {}]   ;;  %s4330_s3 = inlined_call_operand.vmem [shape: f32[2,1,8,8], index: 3, kind: input, shape index: {}]   ;;  %s4331_s4 = inlined_call_operand.vmem [shape: bf16[32,96], index: 4, kind: input, shape index: {}]   ;;  %s4332_s5 = inlined_call_operand.vmem [shape: f32[1,96], index: 5, kind: input, shape index: {}]   ;;  %s4333_s6 = inlined_call_operand.vmem [shape: bf16[32,32], index: 6, kind: input, shape index: {}]   ;;  %s4334_s7 = inlined_call_operand.vmem [shape: f32[1,32], index: 7, kind: input, shape index: {}]   ;;  %s4335_s8 = inlined_call_operand.hbm [shape: f32[1,32], index: 8, kind: input, shape index: {}]   ;;  %s4336_s9 = inlined_call_operand.hbm [shape: f32[1,32], index: 9, kind: input, shape index: {}]   ;;  %s4337_s10 = inlined_call_operand.vmem [shape: bf16[32,32], index: 10, kind: input, shape index: {}]   ;;  %s4338_s11 = inlined_call_operand.vmem [shape: f32[1,32], index: 11, kind: input, shape index: {}]   ;;  %s4339_s12 = inlined_call_operand.vmem [shape: bf16[32,64], index: 12, kind: input, shape index: {}]   ;;  %s4340_s13 = inlined_call_operand.vmem [shape: f32[1,64], index: 13, kind: input, shape index: {}]   ;;  %s4341_s14 = inlined_call_operand.vmem [shape: bf16[32,32], index: 14, kind: input, shape index: {}]   ;;  %s4342_s15 = inlined_call_operand.vmem [shape: f32[1,32], index: 15, kind: input, shape index: {}]   ;;  %s4343_s16 = inlined_call_operand.hbm [shape: f32[1,32], index: 16, kind: input, shape index: {}]   ;;  %s4344_s17 = inlined_call_operand.hbm [shape: f32[1,32], index: 17, kind: input, shape index: {}]   ;;  %s4345_s18 = inlined_call_operand.hbm [shape: bf16[32,64], index: 18, kind: input, shape index: {}]   ;;  %s4346_s19 = inlined_call_operand.hbm [shape: f32[1,64], index: 19, kind: input, shape index: {}]   ;;  %s4347_s20 = inlined_call_operand.vmem [shape: bf16[64,32], index: 20, kind: input, shape index: {}]   ;;  %s4348_s21 = inlined_call_operand.hbm [shape: f32[1,32], index: 21, kind: input, shape index: {}]   ;;  %s4349_s22 = inlined_call_operand.vmem [shape: f32[1,32], index: 22, kind: input, shape index: {}]   ;;  %s4350_s23 = inlined_call_operand.hbm [shape: f32[1,32], index: 23, kind: input, shape index: {}]   ;;  %s4351_s24 = inlined_call_operand.hbm [shape: f32[2,8,32], index: 24, kind: output, shape index: {0}]   ;;  %s4352_s25 = inlined_call_operand.hbm [shape: f32[2,4,8,8], index: 25, kind: output, shape index: {1}]  }
   0x1   :  { %4377 = sst [smem:[#allocation34_spill]] %s4327_s0 }
   0x2   :  { %4378 = sst [smem:[#allocation35_spill]] %s4328_s1 }
   0x3   :  { %4379 = sst [smem:[#allocation36_spill]] %s4329_s2 }
   0x4   :  { %4380 = sst [smem:[#allocation37_spill]] %s4330_s3 }
   0x5   :  { %4381 = sst [smem:[#allocation38_spill]] %s4331_s4 }
   0x6   :  { %4382 = sst [smem:[#allocation39_spill]] %s4332_s5 }
   0x7   :  { %4383 = sst [smem:[#allocation40_spill]] %s4333_s6 }
   0x8   :  { %4384 = sst [smem:[#allocation41_spill]] %s4334_s7 }
   0x9   :  { %4385 = sst [smem:[#allocation42_spill]] %s4335_s8 }
   0xa   :  { %4386 = sst [smem:[#allocation43_spill]] %s4336_s9 }
   0xb   :  { %4387 = sst [smem:[#allocation44_spill]] %s4344_s17 }
   0xc   :  { %4388 = sst [smem:[#allocation45_spill]] %s4349_s22 }
   0xd   :  { %4389 = sst [smem:[#allocation46_spill]] %s4351_s24 }
   0xe   :  { %4390 = sst [smem:[#allocation47_spill]] %s4352_s25 }
   0xf   :  { %31 = vsyncpa [#allocation4], 0 }
  0x10   :  { %32 = vsyncpa [#allocation7], 0 }
  0x11   :  { %33 = vsyncpa [#allocation10], 0 }
  0x12   :  { %34 = vsyncpa [#allocation13], 0 }
  0x13   :  { %35 = vsyncpa [#allocation16], 0 }
  0x14   :  { %36 = vsyncpa [#allocation5], 0 }
  0x15   :  { %38 = vsyncpa [#allocation5 + $0x1], 0 }
  0x16   :  { %39 = vsyncpa [#allocation19], 0 }
  0x17   :  { %41 = vsyncpa [#allocation19 + $0x1], 0  ;;  %s3690_s29 = smov 0   ;;  %s3692_s2 = smov 0  }
  0x18   :  { %s3694_s6 = smov 0   ;;  %s3696_s30 = smov 0  }
  0x19 LB: > { %4391 = sst [smem:[#allocation27_spill]] %s3517_s29  ;;  %s3711_s7 = sadd.s32 4294967295, %s3529_s30   ;;  %s3529_s30 = sphi %s3696_s30, %s4438_s30   ;;  %s3525_s6 = sphi %s3694_s6, %s4440_s6   ;;  %s3521_s2 = sphi %s3692_s2, %s4442_s2   ;;  %s3517_s29 = sphi %s3690_s29, %s4441_s29  }
  0x1a   : > { %4392 = sst [smem:[#allocation28_spill]] %s3525_s6  ;;  %s2693_s3 = sadd.s32 4294967294, %s3529_s30  }
  0x1b   : > { %4393 = sst [smem:[#allocation29_spill]] %s3529_s30  ;;  %s3715_s26 = sadd.s32 1, %s3529_s30  }
  0x1c   : > { %4394 = sst [smem:[#allocation30_spill]] %s3715_s26  ;;  %s578_s1 = sadd.s32 1, %s3525_s6 }
  0x1d   : > { %s575_s8 = ssub.s32 %s3529_s30, %s3715_s26  ;;  %p588_p0 = scmp.ne.s32.totalorder %s3525_s6, %s3521_s2 }
  0x1e   : > { %p576_p1 = scmp.eq.s32.totalorder %s575_s8, 0  ;;  %p589_p2 = scmp.eq.s32.totalorder %s3711_s7, 1 }
  0x1f   : > { %p594_p3 = scmp.ne.s32.totalorder %s3521_s2, %s3517_s29  ;;  %p595_p4 = scmp.eq.s32.totalorder %s2693_s3, 1 }
  0x20   : > { %s3726_s27 = scalar_select %p576_p1, %s3525_s6, %s578_s1  }
  0x21   : > { %p3728_p5 = por %p589_p2, %p588_p0  ;;  %p3732_p6 = por %p595_p4, %p594_p3 }
  0x22   : > { %4395 = sst [smem:[#allocation31_spill]] %s3726_s27  ;;  %p2694_p7 = scmp.ge.s32.totalorder %s3529_s30, 1 }
  0x23   : > { %s4396_s4 = scalar_select %p3728_p5, 1, 0 }
  0x24   : > { %s4398_s28 = scalar_select %p3732_p6, 1, 0 }
  0x25   : > { %4397 = sst [smem:[#allocation32_spill]] %s4396_s4  ;;  %p628_p8 = scmp.lt.s32.totalorder %s3529_s30, 3 }
  0x26   : > { %4399 = sst [smem:[#allocation33_spill]] %s4398_s28  ;;  %p4364_p9 = scmp.eq.s32.totalorder %s3711_s7, 0 }
  0x27   : > { %p3739_p10 = pnand %p2694_p7, %p628_p8  ;;  %s3531_s5 = smov [#allocation6]  }
  0x28   : > { %s664_s0 = sshll.u32 %s3531_s5, 4  ;;  %s3532_s3 = smov [#allocation9]   ;;  %s665_s0 = int_to_ptr.vmem [resolvable:$true] %s664_s0 }
  0x29   : > { %s4400_s9 = scalar_select %p3739_p10, 1, 0 }
  0x2a   : > { %p3029_p11 = pneg %p3739_p10  ;;  %s704_s1 = sshll.u32 %s3532_s3, 4  ;;  %s3751_s1 = int_to_ptr.vmem [resolvable:$true] %s704_s1 }
  0x2b   : > { %s3533_s27 = smov [#allocation12]   ;;  %s4402_s5 = sld [smem:[#allocation43_spill]] }
  0x2c   : > { %p3747_p12 = pnand %p4364_p9, %p3029_p11  ;;  %s728_s6 = sshll.u32 %s3533_s27, 4  ;;  %s3753_s6 = int_to_ptr.vmem [resolvable:$true] %s728_s6 }
  0x2e   : > { %p3763_p0 = pneg %p3747_p12 }
  0x31   : > { %s3191_s29 = scalar_lea.hbm %s4402_s5, 16 }
  0x32   : > { %p3192_p13 = scmp.ne.s32.totalorder %s4402_s5, %s3191_s29  ;;  %p3198_p3 = scmp.lt.u32.totalorder %s3191_s29, %s4402_s5 }
  0x34   : > { %p3194_p1 = pnand %p3763_p0, %p3192_p13 }
  0x36   : > { %p3195_p2 = pneg %p3194_p1 }
  0x38   : > { %p3200_p4 = pnand %p3198_p3, %p3195_p2 }
  0x3a   : > { %3203 = shalt.err (!%p3200_p4)
}
  0x3b   : > { %s3204_s26 = scalar_lea.vmem %s665_s0, 16  ;;  %s3211_s24 = scalar_lea.vmem %s665_s0, 32 }
  0x3c   : > { %p3205_p7 = scmp.ne.s32.totalorder %s665_s0, %s3204_s26  ;;  %p3212_p9 = scmp.lt.s32.totalorder %s665_s0, %s665_s0 }
  0x3d   : > { %p3213_p6 = scmp.lt.s32.totalorder %s3211_s24, %s3204_s26 }
  0x3e   : > { %p3207_p8 = pnand %p3205_p7, %p3763_p0 }
  0x3f   : > { %p3214_p5 = por %p3213_p6, %p3212_p9 }
  0x40   : > { %p3208_p11 = pneg %p3207_p8 }
  0x42   : > { %p3215_p10 = pnand %p3214_p5, %p3208_p11 }
  0x44   : > { %3218 = shalt.err (!%p3215_p10)
}
  0x45   : > { %3035 = dma.hbm_to_vmem [thread:$0]  (!%p3747_p12), %s4402_s5, 16, %s665_s0, [#allocation7]  }
  0x46   : > { %s4404_s17 = sld [smem:[#allocation44_spill]] }
  0x4c   : > { %s3219_s27 = scalar_lea.hbm %s4404_s17, 16 }
  0x4d   : > { %p3220_p13 = scmp.ne.s32.totalorder %s4404_s17, %s3219_s27  ;;  %p3226_p5 = scmp.lt.u32.totalorder %s3219_s27, %s4404_s17 }
  0x4f   : > { %p3222_p1 = pnand %p3220_p13, %p3763_p0 }
  0x51   : > { %p3223_p6 = pneg %p3222_p1 }
  0x53   : > { %p3228_p9 = pnand %p3226_p5, %p3223_p6 }
  0x55   : > { %3231 = shalt.err (!%p3228_p9)
}
  0x56   : > { %s3232_s0 = scalar_lea.vmem %s3751_s1, 16  ;;  %s3239_s25 = scalar_lea.vmem %s3751_s1, 32 }
  0x57   : > { %p3233_p10 = scmp.ne.s32.totalorder %s3751_s1, %s3232_s0  ;;  %p3240_p4 = scmp.lt.s32.totalorder %s3751_s1, %s3751_s1 }
  0x58   : > { %p3241_p7 = scmp.lt.s32.totalorder %s3239_s25, %s3232_s0 }
  0x59   : > { %p3235_p2 = pnand %p3233_p10, %p3763_p0 }
  0x5a   : > { %p3242_p8 = por %p3241_p7, %p3240_p4 }
  0x5b   : > { %p3236_p3 = pneg %p3235_p2 }
  0x5d   : > { %p3243_p11 = pnand %p3242_p8, %p3236_p3 }
  0x5f   : > { %3246 = shalt.err (!%p3243_p11)
}
  0x60   : > { %3041 = dma.hbm_to_vmem [thread:$0]  (!%p3747_p12), %s4404_s17, 16, %s3751_s1, [#allocation10]  }
  0x61   : > { %s3247_s29 = scalar_lea.hbm %s4346_s19, 16 }
  0x62   : > { %p3248_p13 = scmp.ne.s32.totalorder %s4346_s19, %s3247_s29  ;;  %p3254_p5 = scmp.lt.u32.totalorder %s3247_s29, %s4346_s19 }
  0x64   : > { %p3250_p1 = pnand %p3248_p13, %p3763_p0 }
  0x66   : > { %p3251_p6 = pneg %p3250_p1 }
  0x68   : > { %p3256_p9 = pnand %p3254_p5, %p3251_p6 }
  0x6a   : > { %3259 = shalt.err (!%p3256_p9)
}
  0x6b   : > { %s3260_s1 = scalar_lea.vmem %s3753_s6, 16  ;;  %s3267_s25 = scalar_lea.vmem %s3753_s6, 32 }
  0x6c   : > { %p3261_p10 = scmp.ne.s32.totalorder %s3753_s6, %s3260_s1  ;;  %p3268_p4 = scmp.lt.s32.totalorder %s3753_s6, %s3753_s6 }
  0x6d   : > { %p3269_p7 = scmp.lt.s32.totalorder %s3267_s25, %s3260_s1 }
  0x6e   : > { %p3263_p2 = pnand %p3261_p10, %p3763_p0 }
  0x6f   : > { %p3270_p8 = por %p3269_p7, %p3268_p4 }
  0x70   : > { %p3264_p3 = pneg %p3263_p2 }
  0x72   : > { %p3271_p11 = pnand %p3270_p8, %p3264_p3 }
  0x74   : > { %3274 = shalt.err (!%p3271_p11)
}
  0x75   : > { %3047 = dma.hbm_to_vmem [thread:$0]  (!%p3747_p12), %s4346_s19, 16, %s3753_s6, [#allocation13]  }
  0x76   : > { %s3534_s28 = smov [#allocation3]   ;;  %s3535_s29 = smov [#allocation8]  }
  0x77   : > { %s653_s22 = sshll.u32 %s3534_s28, 4  ;;  %s693_s27 = sshll.u32 %s3535_s29, 4  ;;  %s654_s22 = int_to_ptr.vmem [resolvable:$true] %s653_s22  ;;  %s694_s27 = int_to_ptr.vmem [resolvable:$true] %s693_s27 }
  0x78   : > { %s4405_s0 = sld [smem:[#allocation42_spill]] }
  0x7e   : > { %s3275_s1 = scalar_lea.hbm %s4405_s0, 16 }
  0x7f   : > { %p3276_p13 = scmp.ne.s32.totalorder %s4405_s0, %s3275_s1  ;;  %p3282_p5 = scmp.lt.u32.totalorder %s3275_s1, %s4405_s0 }
  0x81   : > { %p3278_p1 = pnand %p3276_p13, %p3763_p0 }
  0x83   : > { %p3279_p6 = pneg %p3278_p1 }
  0x85   : > { %p3284_p9 = pnand %p3282_p5, %p3279_p6 }
  0x87   : > { %3287 = shalt.err (!%p3284_p9)
}
  0x88   : > { %s3288_s6 = scalar_lea.vmem %s654_s22, 16  ;;  %s3295_s30 = scalar_lea.vmem %s654_s22, 32 }
  0x89   : > { %p3289_p10 = scmp.ne.s32.totalorder %s654_s22, %s3288_s6  ;;  %p3296_p4 = scmp.lt.s32.totalorder %s654_s22, %s654_s22 }
  0x8a   : > { %p3297_p7 = scmp.lt.s32.totalorder %s3295_s30, %s3288_s6 }
  0x8b   : > { %p3291_p2 = pnand %p3289_p10, %p3763_p0 }
  0x8c   : > { %p3298_p8 = por %p3297_p7, %p3296_p4 }
  0x8d   : > { %p3292_p3 = pneg %p3291_p2 }
  0x8f   : > { %p3299_p11 = pnand %p3298_p8, %p3292_p3 }
  0x91   : > { %3302 = shalt.err (!%p3299_p11)
}
  0x92   : > { %3032 = dma.hbm_to_vmem [thread:$0]  (!%p3747_p12), %s4405_s0, 16, %s654_s22, [#allocation4]  }
  0x93   : > { %s3303_s26 = scalar_lea.hbm %s4343_s16, 16 }
  0x94   : > { %p3304_p13 = scmp.ne.s32.totalorder %s4343_s16, %s3303_s26  ;;  %p3310_p5 = scmp.lt.u32.totalorder %s3303_s26, %s4343_s16 }
  0x96   : > { %p3306_p1 = pnand %p3304_p13, %p3763_p0 }
  0x98   : > { %p3307_p6 = pneg %p3306_p1 }
  0x9a   : > { %p3312_p9 = pnand %p3310_p5, %p3307_p6 }
  0x9c   : > { %3315 = shalt.err (!%p3312_p9)
}
  0x9d   : > { %s3316_s6 = scalar_lea.vmem %s694_s27, 16  ;;  %s3323_s22 = scalar_lea.vmem %s694_s27, 32 }
  0x9e   : > { %p3317_p10 = scmp.ne.s32.totalorder %s694_s27, %s3316_s6  ;;  %p3324_p4 = scmp.lt.s32.totalorder %s694_s27, %s694_s27 }
  0x9f   : > { %p3325_p7 = scmp.lt.s32.totalorder %s3323_s22, %s3316_s6 }
  0xa0   : > { %p3319_p2 = pnand %p3317_p10, %p3763_p0 }
  0xa1   : > { %p3326_p8 = por %p3325_p7, %p3324_p4 }
  0xa2   : > { %p3320_p3 = pneg %p3319_p2 }
  0xa4   : > { %p3327_p11 = pnand %p3326_p8, %p3320_p3 }
  0xa6   : > { %3330 = shalt.err (!%p3327_p11)
}
  0xa7   : > { %3038 = dma.hbm_to_vmem [thread:$0]  (!%p3747_p12), %s4343_s16, 16, %s694_s27, [#allocation7]  }
  0xa8   : > { %s3536_s28 = smov [#allocation11]   ;;  %s3331_s24 = scalar_lea.hbm %s4345_s18, 256 }
  0xa9   : > { %s714_s17 = sshll.u32 %s3536_s28, 4  ;;  %p3332_p13 = scmp.ne.s32.totalorder %s4345_s18, %s3331_s24  ;;  %s715_s17 = int_to_ptr.vmem [resolvable:$true] %s714_s17 }
  0xaa   : > { %p3338_p5 = scmp.lt.u32.totalorder %s3331_s24, %s4345_s18 }
  0xab   : > { %p3334_p1 = pnand %p3332_p13, %p3763_p0 }
  0xad   : > { %p3335_p6 = pneg %p3334_p1 }
  0xaf   : > { %p3340_p9 = pnand %p3338_p5, %p3335_p6 }
  0xb1   : > { %3343 = shalt.err (!%p3340_p9)
}
  0xb2   : > { %s3344_s27 = scalar_lea.vmem %s715_s17, 256  ;;  %p3352_p4 = scmp.lt.s32.totalorder %s715_s17, %s715_s17 }
  0xb3   : > { %p3345_p10 = scmp.ne.s32.totalorder %s715_s17, %s3344_s27  ;;  %p3353_p7 = scmp.lt.s32.totalorder %s3344_s27, %s3344_s27 }
  0xb5   : > { %p3347_p2 = pnand %p3345_p10, %p3763_p0  ;;  %p3354_p8 = por %p3353_p7, %p3352_p4 }
  0xb7   : > { %p3348_p3 = pneg %p3347_p2 }
  0xb9   : > { %p3355_p11 = pnand %p3354_p8, %p3348_p3 }
  0xbb   : > { %3358 = shalt.err (!%p3355_p11)
}
  0xbc   : > { %s3537_s22 = smov 64   ;;  %s3538_s30 = smov 4  }
  0xbd   : > { %3044 = dma.hbm_to_vmem [thread:$0]  (!%p3747_p12), %s4345_s18, 256, %s715_s17, [#allocation10], %s3537_s22, %s3537_s22, %s3538_s30  }
  0xbe   : > { %s3539_s29 = smov [#allocation14]   ;;  %s3540_s24 = smov [#allocation15]  }
  0xbf   : > { %s742_s26 = sshll.u32 %s3539_s29, 4  ;;  %s756_s1 = sshll.u32 %s3540_s24, 4  ;;  %s743_s26 = int_to_ptr.vmem [resolvable:$true] %s742_s26  ;;  %s3881_s1 = int_to_ptr.vmem [resolvable:$true] %s756_s1 }
  0xc0   : > { %s3359_s6 = scalar_lea.hbm %s4348_s21, 16 }
  0xc1   : > { %p3360_p13 = scmp.ne.s32.totalorder %s4348_s21, %s3359_s6  ;;  %p3366_p5 = scmp.lt.u32.totalorder %s3359_s6, %s4348_s21 }
  0xc3   : > { %p3362_p1 = pnand %p3360_p13, %p3763_p0 }
  0xc5   : > { %p3363_p6 = pneg %p3362_p1 }
  0xc7   : > { %p3368_p9 = pnand %p3366_p5, %p3363_p6 }
  0xc9   : > { %3371 = shalt.err (!%p3368_p9)
}
  0xca   : > { %s3372_s22 = scalar_lea.vmem %s743_s26, 16  ;;  %s3379_s30 = scalar_lea.vmem %s743_s26, 32 }
  0xcb   : > { %p3373_p10 = scmp.ne.s32.totalorder %s743_s26, %s3372_s22  ;;  %p3380_p4 = scmp.lt.s32.totalorder %s743_s26, %s743_s26 }
  0xcc   : > { %p3381_p7 = scmp.lt.s32.totalorder %s3379_s30, %s3372_s22 }
  0xcd   : > { %p3375_p2 = pnand %p3373_p10, %p3763_p0 }
  0xce   : > { %p3382_p8 = por %p3381_p7, %p3380_p4 }
  0xcf   : > { %p3376_p3 = pneg %p3375_p2 }
  0xd1   : > { %p3383_p11 = pnand %p3382_p8, %p3376_p3 }
  0xd3   : > { %3386 = shalt.err (!%p3383_p11)
}
  0xd4   : > { %3050 = dma.hbm_to_vmem [thread:$0]  (!%p3747_p12), %s4348_s21, 16, %s743_s26, [#allocation13]  }
  0xd5   : > { %s3387_s25 = scalar_lea.hbm %s4350_s23, 16 }
  0xd6   : > { %p3388_p13 = scmp.ne.s32.totalorder %s4350_s23, %s3387_s25  ;;  %p3394_p5 = scmp.lt.u32.totalorder %s3387_s25, %s4350_s23 }
  0xd8   : > { %p3390_p1 = pnand %p3388_p13, %p3763_p0 }
  0xda   : > { %p3391_p6 = pneg %p3390_p1 }
  0xdc   : > { %p3396_p9 = pnand %p3394_p5, %p3391_p6 }
  0xde   : > { %3399 = shalt.err (!%p3396_p9)
}
  0xdf   : > { %s3400_s26 = scalar_lea.vmem %s3881_s1, 16  ;;  %s3407_s17 = scalar_lea.vmem %s3881_s1, 32 }
  0xe0   : > { %p3401_p10 = scmp.ne.s32.totalorder %s3881_s1, %s3400_s26  ;;  %p3408_p4 = scmp.lt.s32.totalorder %s3881_s1, %s3881_s1 }
  0xe1   : > { %p3409_p7 = scmp.lt.s32.totalorder %s3407_s17, %s3400_s26 }
  0xe2   : > { %p3403_p2 = pnand %p3401_p10, %p3763_p0 }
  0xe3   : > { %p3410_p8 = por %p3409_p7, %p3408_p4 }
  0xe4   : > { %p3404_p3 = pneg %p3403_p2 }
  0xe6   : > { %p3411_p11 = pnand %p3410_p8, %p3404_p3 }
  0xe8   : > { %3414 = shalt.err (!%p3411_p11)
}
  0xe9   : > { %3053 = dma.hbm_to_vmem [thread:$0]  (!%p3747_p12), %s4350_s23, 16, %s3881_s1, [#allocation16]  }
  0xea   : > { %p4406_p13 = scmp.ne.s32.totalorder %s4400_s9, 0 }
  0xeb   : > { %p4407_p0 = scmp.eq.s32.totalorder (!%p4406_p13), %s3711_s7, 0 }
  0xec   : > { %797 = sbr.rel (%p4406_p13) target bundleno = 4589 (0x11ed), region = 116 }
  0xf3   : > { %3488 = dma.done.wait (%p4407_p0), [#allocation4], 16   ;;  %p4408_p1 = pmov %p4407_p0 }
  0xf4   : > { %p4409_p6 = pmov %p4407_p0 }
  0xf5   : > { %3490 = vsyncadd (%p4408_p1), [#allocation4], 4294967280 }
  0xf6   : > { %3492 = dma.done.wait (%p4409_p6), [#allocation7], 32   ;;  %p4410_p5 = pmov %p4407_p0 }
  0xf7   : > { %p4411_p9 = pmov %p4407_p0 }
  0xf8   : > { %3494 = vsyncadd (%p4410_p5), [#allocation7], 4294967264 }
  0xf9   : > { %3496 = dma.done.wait (%p4411_p9), [#allocation10], 272   ;;  %p4412_p12 = pmov %p4407_p0 }
  0xfa   : > { %p4413_p10 = pmov %p4407_p0 }
  0xfb   : > { %3498 = vsyncadd (%p4412_p12), [#allocation10], 4294967024 }
  0xfc   : > { %3500 = dma.done.wait (%p4413_p10), [#allocation13], 32   ;;  %p4414_p2 = pmov %p4407_p0 }
  0xfd   : > { %p4415_p3 = pmov %p4407_p0 }
  0xfe   : > { %3502 = vsyncadd (%p4414_p2), [#allocation13], 4294967264 }
  0xff   : > { %3504 = dma.done.wait (%p4415_p3), [#allocation16], 16   ;;  %p4416_p4 = pmov %p4407_p0 }
 0x100   : > { %p909_p7 = scmp.lt.s32.totalorder %s3711_s7, 1  ;;  %v3541_v0 = vmov 0.0   ;;  %vm3542_vm0 = vmmov 0   ;;  %s4417_s0 = sld [smem:[#allocation35_spill]]  ;;  %vm954_vm1 = vcmask 261120   ;;  %vm1002_vm2 = vcmask 64512  }
 0x101   : > { %3506 = vsyncadd (%p4416_p4), [#allocation16], 4294967280  ;;  %2837 = vmatprep.subr.bf16.mxu1 %v3541_v0  ;;  %2841 = vmatprep.mubr.msk.bf16.mxu1 %vm3542_vm0, %v3541_v0  ;;  %s4418_s25 = sld [smem:[#allocation38_spill]]  ;;  %s4419_s26 = sld [smem:[#allocation39_spill]]  ;;  %vm1068_vm3 = vcmask 1043456   ;;  %vm1229_vm4 = vcmask 130112  }
 0x102   : > { %s910_s9 = scalar_select %p909_p7, %s3711_s7, 1  ;;  %2851 = vmatprep.subr.bf16.mxu0 %v3541_v0  ;;  %2853 = vmatprep.mubr.msk.bf16.mxu0 %vm3542_vm0, %v3541_v0  ;;  %vm1347_vm5 = vcmask 195712   ;;  %vm1465_vm6 = vcmask 261312   ;;  %vm2377_vm7 = vcmask 523264  }
 0x103   : > { %s3543_s17 = smov 120   ;;  %s3544_s22 = smov 96  }
 0x104   : > { %s3955_s8 = sshll.u32 %s910_s9, 3  ;;  %s3545_s30 = smov 80  }
 0x105   : > { %s4376_s9 = smov 88   ;;  %s3547_s3 = smov 72  }
 0x106   : > { %s916_s28 = scalar_lea.vmem %s4417_s0, %s3955_s8  ;;  %s3548_s1 = smov 112  }
 0x107   : > { %v3137_v1 = vld [vmem:[%s4418_s25] sm:$0xff]   ;;  %v3138_v2 = vld [vmem:[%s4418_s25 + $0x8] sm:$0xff]   ;;  %s3549_s0 = smov 104   ;;  %s4420_s24 = sld [smem:[#allocation36_spill]] }
 0x108   : > { %2838 = vmatpush3.bf16.msra.mxu1 %v3137_v1  ;;  %v3967_v3 = vld [vmem:[%s916_s28] sm:$0xff]  ;;  %s3550_s6 = smov 56   ;;  %s3551_s27 = smov 64  }
 0x109   : > { %2839 = vmatprep.subr.bf16.mxu1 %v3541_v0  ;;  %v930_v4 = vpack.c.bf16 %v3967_v3, %v3967_v3  ;;  %v2719_v5 = vld [vmem:[%s4419_s26] ss:$0 sm:$0xff]  ;;  %s3552_s5 = smov 40   ;;  %s3553_s26 = smov 48  }
 0x10a   : > { %s4374_s28 = smov 8   ;;  %s4425_s29 = smov 88  }
 0x10c   : > { %2840 = vmatpush3.bf16.msra.mxu1 %v3138_v2 }
 0x10d   : > { %2845 = vmatprep.subr.bf16.mxu1 %v3541_v0  ;;  %s920_s4 = scalar_lea.vmem %s4420_s24, %s3955_s8 }
 0x10e   : > { %v928_v24 = vld [vmem:[%s920_s4] sm:$0xff]  ;;  %s4421_s4 = sld [smem:[#allocation40_spill]] }
 0x10f   : > { %2842 = vmatmul.mubr.msk.bf16.vlgmr.msra.gmra.mrb[0].mxu1 %vm954_vm1, %v930_v4 }
 0x110   : > { %2847 = vmatprep.mubr.msk.bf16.mxu1 %vm3542_vm0, %v3541_v0 }
 0x1e2   : > { %v992_v6 = vpop.f32.mrb[0].mxu1 }
 0x1e3   : > { %v993_v7 = vadd.f32 %v2719_v5, %v992_v6  ;;  %v2843_v8 = vpop.f32.mrb[1].mxu1 }
 0x1e4   : > { %v995_v9 = vpop.f32.mrb[2].mxu1 }
 0x1e5   : > { %v3979_v10 = vpack.c.bf16 %v993_v7, %v993_v7  ;;  %v2844_v11 = vpop.f32.mrb[3].mxu1 }
 0x1e7   : > { %1113 = vrot.lane.b32.xlu1 %v3979_v10, %s3543_s17  ;;  %1000 = vrot.lane.b32.xlu0 %v3979_v10, %s3544_s22 }
 0x1eb   : > { %1233 = vrot.lane.b32.xlu1 %v3979_v10, %s3545_s30  ;;  %1115 = vrot.lane.b32.xlu0 %v3979_v10, %s4376_s9 }
 0x1ef   : > { %1351 = vrot.lane.b32.xlu1 %v3979_v10, %s3547_s3  ;;  %1231 = vrot.lane.b32.xlu0 %v3979_v10, %s3548_s1 }
 0x1f3   : > { %1349 = vrot.lane.b32.xlu0 %v3979_v10, %s3549_s0 }
 0x259   : > { %v1001_v12 = vpop.permute.xlu0 %1000  ;;  %v1114_v15 = vpop.permute.xlu1 %1113 }
 0x25a   : > { %v1007_v13 = vsel %vm1002_vm2, %v1001_v12, 0 }
 0x25b   : > { %2846 = vmatpush3.bf16.xpose.msra.mxu1 %v1007_v13 }
 0x25c   : > { %2857 = vmatprep.subr.bf16.mxu1 %v3541_v0 }
 0x25d   : > { %v1116_v14 = vpop.permute.xlu0 %1115  ;;  %v1234_v17 = vpop.permute.xlu1 %1233 }
 0x25e   : > { %v1121_v16 = vsel %vm1002_vm2, %v1116_v14, 0  ;;  %v1239_v18 = vsel %vm1002_vm2, %v1234_v17, 0 }
 0x261   : > { %v1352_v19 = vpop.permute.xlu1 %1351  ;;  %v1232_v20 = vpop.permute.xlu0 %1231 }
 0x262   : > { %2848 = vmatmul.mubr.msk.bf16.vlgmr.msra.gmra.mrb[4].mxu1 %vm1002_vm2, %v3979_v10  ;;  %v1357_v21 = vsel %vm1002_vm2, %v1352_v19, 0 }
 0x263   : > { %2858 = vmatpush3.bf16.xpose.msra.mxu1 %v1121_v16  ;;  %2859 = vmatprep.mubr.msk.bf16.mxu1 %vm3542_vm0, %v3541_v0 }
 0x264   : > { %2869 = vmatprep.subr.bf16.mxu1 %v3541_v0 }
 0x265   : > { %v1350_v22 = vpop.permute.xlu0 %1349 }
 0x26a   : > { %2860 = vmatmul.mubr.msk.bf16.vlgmr.msra.gmra.mrb[8].mxu1 %vm1002_vm2, %v1114_v15 }
 0x26b   : > { %2870 = vmatpush3.bf16.xpose.msra.mxu1 %v1239_v18  ;;  %2871 = vmatprep.mubr.msk.bf16.mxu1 %vm3542_vm0, %v3541_v0 }
 0x26c   : > { %2881 = vmatprep.subr.bf16.mxu1 %v3541_v0 }
 0x272   : > { %2872 = vmatmul.mubr.msk.bf16.vlgmr.msra.gmra.mrb[12].mxu1 %vm1002_vm2, %v1232_v20 }
 0x273   : > { %2882 = vmatpush3.bf16.xpose.msra.mxu1 %v1357_v21  ;;  %2883 = vmatprep.mubr.msk.bf16.mxu1 %vm3542_vm0, %v3541_v0 }
 0x274   : > { %2893 = vmatprep.subr.bf16.mxu1 %v3541_v0 }
 0x27a   : > { %2884 = vmatmul.mubr.msk.bf16.vlgmr.msra.gmra.mrb[16].mxu1 %vm1002_vm2, %v1350_v22 }
 0x27b   : > { %2897 = vmatprep.mubr.msk.bf16.mxu1 %vm3542_vm0, %v3541_v0 }
 0x335   : > { %v1043_v23 = vpop.f32.mrb[4].mxu1 }
 0x336   : > { %v1049_v25 = vmul.f32 0.35355338, %v1043_v23  ;;  %v2849_v26 = vpop.f32.mrb[5].mxu1 }
 0x337   : > { %v1046_v27 = vpop.f32.mrb[6].mxu1 }
 0x338   : > { %v2850_v28 = vpop.f32.mrb[7].mxu1  ;;  %v1050_v29 = vadd.f32 %v1049_v25, %v928_v24 }
 0x33a   : > { %v1051_v30 = vsel %vm1002_vm2, %v1050_v29, -inf }
 0x33b   : > { %1052 = vmax.xlane.f32.xlu1 %v1051_v30 }
 0x33d   : > { %v1157_v31 = vpop.f32.mrb[8].mxu1 }
 0x33e   : > { %v1163_v32 = vmul.f32 0.35355338, %v1157_v31  ;;  %v2861_v33 = vpop.f32.mrb[9].mxu1 }
 0x33f   : > { %v1160_v34 = vpop.f32.mrb[10].mxu1 }
 0x340   : > { %v2862_v35 = vpop.f32.mrb[11].mxu1  ;;  %v1164_v36 = vadd.f32 %v1163_v32, %v928_v24 }
 0x342   : > { %v1165_v37 = vsel %vm1002_vm2, %v1164_v36, -inf }
 0x343   : > { %1166 = vmax.xlane.f32.xlu0 %v1165_v37 }
 0x345   : > { %v1275_v38 = vpop.f32.mrb[12].mxu1 }
 0x346   : > { %v1281_v39 = vmul.f32 0.35355338, %v1275_v38  ;;  %v2873_v40 = vpop.f32.mrb[13].mxu1 }
 0x347   : > { %v1278_v41 = vpop.f32.mrb[14].mxu1 }
 0x348   : > { %v2874_v42 = vpop.f32.mrb[15].mxu1  ;;  %v1282_v43 = vadd.f32 %v1281_v39, %v928_v24 }
 0x349   : > { %v3139_v42 = vld [vmem:[%s4421_s4] sm:$0xff]  }
 0x34a   : > { %v1283_v44 = vsel %vm1002_vm2, %v1282_v43, -inf  ;;  %2894 = vmatpush3.bf16.msra.mxu1 %v3139_v42 }
 0x34b   : > { %1284 = vmax.xlane.f32.xlu0 %v1283_v44  ;;  %2895 = vmatprep.subr.bf16.mxu1 %v3541_v0 }
 0x34d   : > { %v1393_v45 = vpop.f32.mrb[16].mxu1 }
 0x34e   : > { %v1399_v46 = vmul.f32 0.35355338, %v1393_v45  ;;  %v2885_v47 = vpop.f32.mrb[17].mxu1 }
 0x34f   : > { %v1396_v48 = vpop.f32.mrb[18].mxu1 }
 0x350   : > { %v2886_v49 = vpop.f32.mrb[19].mxu1  ;;  %v1400_v50 = vadd.f32 %v1399_v46, %v928_v24 }
 0x352   : > { %v1401_v51 = vsel %vm1002_vm2, %v1400_v50, -inf }
 0x353   : > { %1402 = vmax.xlane.f32.xlu1 %v1401_v51 }
 0x3c8   : > { %v1053_v52 = vpop.xlane.xlu1 %1052 }
 0x3c9   : > { %v1054_v53 = vsub.f32 %v1050_v29, %v1053_v52 }
 0x3cb   : > { %v1055_v54 = vmul.f32 1.442695, %v1054_v53 }
 0x3cd   : > { %3153 = vpow2.f32 %v1055_v54 }
 0x3d0   : > { %v1167_v55 = vpop.xlane.xlu0 %1166 }
 0x3d1   : > { %v1168_v56 = vsub.f32 %v1164_v36, %v1167_v55 }
 0x3d3   : > { %v1169_v57 = vmul.f32 1.442695, %v1168_v56 }
 0x3d5   : > { %3155 = vpow2.f32 %v1169_v57 }
 0x3d7   : > { %v3154_v58 = vpop.eup %3153 }
 0x3d8   : > { %v1285_v59 = vpop.xlane.xlu0 %1284  ;;  %v1057_v60 = vsel %vm1002_vm2, %v3154_v58, 0.0 }
 0x3d9   : > { %v1286_v61 = vsub.f32 %v1282_v43, %v1285_v59  ;;  %1058 = vadd.xlane.f32.xlu0 %v1057_v60  ;;  %v3140_v43 = vld [vmem:[%s4421_s4 + $0x8] sm:$0xff]  }
 0x3da   : > { %2896 = vmatpush3.bf16.msra.mxu1 %v3140_v43 }
 0x3db   : > { %v1287_v62 = vmul.f32 1.442695, %v1286_v61  ;;  %2909 = vmatprep.subr.bf16.mxu1 %v3541_v0 }
 0x3dd   : > { %3157 = vpow2.f32 %v1287_v62 }
 0x3df   : > { %v3156_v63 = vpop.eup %3155 }
 0x3e0   : > { %v1171_v1 = vsel %vm1002_vm2, %v3156_v63, 0.0  ;;  %v1403_v5 = vpop.xlane.xlu1 %1402 }
 0x3e1   : > { %1172 = vadd.xlane.f32.xlu1 %v1171_v1  ;;  %v1404_v6 = vsub.f32 %v1400_v50, %v1403_v5 }
 0x3e3   : > { %v1405_v7 = vmul.f32 1.442695, %v1404_v6 }
 0x3e5   : > { %3159 = vpow2.f32 %v1405_v7 }
 0x3e7   : > { %v3158_v2 = vpop.eup %3157 }
 0x3e8   : > { %v1289_v4 = vsel %vm1002_vm2, %v3158_v2, 0.0 }
 0x3e9   : > { %1290 = vadd.xlane.f32.xlu0 %v1289_v4 }
 0x3ef   : > { %v3160_v8 = vpop.eup %3159 }
 0x3f0   : > { %v1407_v9 = vsel %vm1002_vm2, %v3160_v8, 0.0 }
 0x3f2   : > { %1177 = vrot.lane.b32.xlu1 %v3979_v10, %s3550_s6  ;;  %s4422_s6 = sld [smem:[#allocation41_spill]] }
 0x3f8   : > { %v2731_v57 = vld [vmem:[%s4422_s6] ss:$0 sm:$0xff]  ;;  %s4428_s6 = smov 24  }
 0x3ff   : > { %1063 = vrot.lane.b32.xlu0 %v3979_v10, %s3551_s27 }
 0x403   : > { %1413 = vrot.lane.b32.xlu0 %v3979_v10, %s3552_s5  ;;  %s4373_s5 = smov 16  }
 0x416   : > { %1408 = vadd.xlane.f32.xlu1 %v1407_v9 }
 0x427   : > { %1295 = vrot.lane.b32.xlu1 %v3979_v10, %s3553_s26  ;;  %s4372_s26 = smov 24  }
 0x466   : > { %v1059_v11 = vpop.xlane.xlu0 %1058 }
 0x467   : > { %3161 = vrcp.f32 %v1059_v11 }
 0x46e   : > { %v1173_v12 = vpop.xlane.xlu1 %1172 }
 0x46f   : > { %3163 = vrcp.f32 %v1173_v12  ;;  %v3143_v12 = vld [vmem:[%s4337_s10] sm:$0xff]  }
 0x471   : > { %v3162_v13 = vpop.eup %3161 }
 0x472   : > { %v1061_v15 = vmul.f32 %v3162_v13, %v3154_v58  ;;  %v1178_v18 = vpop.permute.xlu1 %1177  ;;  %v3144_v13 = vld [vmem:[%s4337_s10 + $0x8] sm:$0xff]  }
 0x473   : > { %v1183_v21 = vsel %vm1068_vm3, %v1178_v18, 0  ;;  %v2735_v18 = vld [vmem:[#allocation3] ss:$0 sm:$0xff] }
 0x474   : > { %v1062_v19 = vpack.c.bf16 %v1061_v15, %v1061_v15 }
 0x476   : > { %v1291_v14 = vpop.xlane.xlu0 %1290 }
 0x477   : > { %3165 = vrcp.f32 %v1291_v14 }
 0x479   : > { %v3164_v20 = vpop.eup %3163 }
 0x47a   : > { %v1064_v16 = vpop.permute.xlu0 %1063  ;;  %v1175_v10 = vmul.f32 %v3164_v20, %v3156_v63  ;;  %v2736_v20 = vld [vmem:[#allocation6] ss:$0 sm:$0xff] }
 0x47b   : > { %v1070_v17 = vsel %vm1068_vm3, %v1064_v16, 0 }
 0x47c   : > { %2852 = vmatpush3.bf16.msra.mxu0 %v1070_v17  ;;  %v1176_v22 = vpack.c.bf16 %v1175_v10, %v1175_v10 }
 0x47d   : > { %2863 = vmatprep.subr.bf16.mxu0 %v3541_v0 }
 0x47e   : > { %v1414_v28 = vpop.permute.xlu0 %1413 }
 0x47f   : > { %2854 = vmatmul.mubr.msk.bf16.vlgmr.msra.gmra.mrb[0].mxu0 %vm1002_vm2, %v1062_v19  ;;  %v1419_v30 = vsel %vm1068_vm3, %v1414_v28, 0 }
 0x480   : > { %2864 = vmatpush3.bf16.msra.mxu0 %v1183_v21  ;;  %2865 = vmatprep.mubr.msk.bf16.mxu0 %vm3542_vm0, %v3541_v0 }
 0x481   : > { %2875 = vmatprep.subr.bf16.mxu0 %v3541_v0  ;;  %v3166_v23 = vpop.eup %3165 }
 0x482   : > { %v1293_v25 = vmul.f32 %v3166_v23, %v3158_v2  ;;  %v2741_v23 = vld [vmem:[%s4340_s13] ss:$0 sm:$0xff] }
 0x484   : > { %v1294_v29 = vpack.c.bf16 %v1293_v25, %v1293_v25 }
 0x487   : > { %2866 = vmatmul.mubr.msk.bf16.vlgmr.msra.gmra.mrb[4].mxu0 %vm1002_vm2, %v1176_v22 }
 0x488   : > { %2877 = vmatprep.mubr.msk.bf16.mxu0 %vm3542_vm0, %v3541_v0 }
 0x4a3   : > { %v1409_v24 = vpop.xlane.xlu1 %1408 }
 0x4a4   : > { %3167 = vrcp.f32 %v1409_v24 }
 0x4a7   : > { %v1296_v26 = vpop.permute.xlu1 %1295 }
 0x4a8   : > { %v1301_v27 = vsel %vm1068_vm3, %v1296_v26, 0 }
 0x4a9   : > { %2876 = vmatpush3.bf16.msra.mxu0 %v1301_v27 }
 0x4aa   : > { %2887 = vmatprep.subr.bf16.mxu0 %v3541_v0 }
 0x4ac   : > { %2878 = vmatmul.mubr.msk.bf16.vlgmr.msra.gmra.mrb[8].mxu0 %vm1002_vm2, %v1294_v29 }
 0x4ad   : > { %2888 = vmatpush3.bf16.msra.mxu0 %v1419_v30  ;;  %2889 = vmatprep.mubr.msk.bf16.mxu0 %vm3542_vm0, %v3541_v0 }
 0x4ae   : > { %v3168_v31 = vpop.eup %3167  ;;  %2901 = vmatprep.subr.bf16.mxu0 %v3541_v0 }
 0x4af   : > { %v1411_v32 = vmul.f32 %v3168_v31, %v3160_v8  ;;  %v3141_v8 = vld [vmem:[%s4339_s12] sm:$0xff]  }
 0x4b0   : > { %v2737_v31 = vld [vmem:[%s4338_s11] ss:$0 sm:$0xff] }
 0x4b1   : > { %v1412_v33 = vpack.c.bf16 %v1411_v32, %v1411_v32 }
 0x4b4   : > { %2890 = vmatmul.mubr.msk.bf16.vlgmr.msra.gmra.mrb[12].mxu0 %vm1002_vm2, %v1412_v33 }
 0x4b5   : > { %2905 = vmatprep.mubr.msk.bf16.mxu0 %vm3542_vm0, %v3541_v0  ;;  %2902 = vmatpush3.bf16.msra.mxu0 %v3143_v12 }
 0x4b6   : > { %2903 = vmatprep.subr.bf16.mxu0 %v3541_v0 }
 0x4b9   : > { %2904 = vmatpush3.bf16.msra.mxu0 %v3144_v13 }
 0x4ba   : > { %2917 = vmatprep.subr.bf16.mxu0 %v3541_v0 }
 0x552   : > { %v1106_v34 = vpop.f32.mrb[0].mxu0 }
 0x553   : > { %1112 = vst.msk [vmem:[#allocation2] sm:$0xff] %vm1002_vm2, %v1106_v34  ;;  %v2855_v35 = vpop.f32.mrb[1].mxu0 }
 0x554   : > { %v1109_v36 = vpop.f32.mrb[2].mxu0 }
 0x555   : > { %v2856_v37 = vpop.f32.mrb[3].mxu0 }
 0x55a   : > { %v1219_v38 = vpop.f32.mrb[4].mxu0 }
 0x55b   : > { %1226 = vrot.lane.b32.xlu1 %v1219_v38, %s4374_s28  ;;  %v2867_v39 = vpop.f32.mrb[5].mxu0  ;;  %s4423_s28 = sld [smem:[#allocation34_spill]] }
 0x55c   : > { %v1222_v40 = vpop.f32.mrb[6].mxu0 }
 0x55d   : > { %v2868_v41 = vpop.f32.mrb[7].mxu0 }
 0x561   : > { %s912_s9 = scalar_lea.vmem %s4423_s28, %s3955_s8 }
 0x562   : > { %v927_v9 = vld [vmem:[%s912_s9] sm:$0xff] }
 0x563   : > { %v1633_v11 = vpack.c.bf16 %v927_v9, %v927_v9 }
 0x57f   : > { %v1337_v44 = vpop.f32.mrb[8].mxu0 }
 0x580   : > { %1344 = vrot.lane.b32.xlu0 %v1337_v44, %s4373_s5  ;;  %v2879_v45 = vpop.f32.mrb[9].mxu0  ;;  %s3557_s5 = smov [#allocation18]  }
 0x581   : > { %v1340_v46 = vpop.f32.mrb[10].mxu0  ;;  %s3419_s9 = sshll.u32 %s3557_s5, 4  ;;  %s3420_s9 = int_to_ptr.vmem [resolvable:$false] %s3419_s9 }
 0x582   : > { %v2880_v47 = vpop.f32.mrb[11].mxu0 }
 0x587   : > { %v1455_v48 = vpop.f32.mrb[12].mxu0 }
 0x588   : > { %1462 = vrot.lane.b32.xlu1 %v1455_v48, %s4372_s26  ;;  %v2891_v49 = vpop.f32.mrb[13].mxu0  ;;  %s4427_s26 = smov 16  }
 0x589   : > { %v1458_v50 = vpop.f32.mrb[14].mxu0 }
 0x58a   : > { %v2892_v51 = vpop.f32.mrb[15].mxu0 }
 0x5cd   : > { %v1227_v52 = vpop.permute.xlu1 %1226 }
 0x5ce   : > { %1230 = vst.msk [vmem:[#allocation2] sm:$0xff] %vm1229_vm4, %v1227_v52 }
 0x5f2   : > { %v1345_v53 = vpop.permute.xlu0 %1344 }
 0x5f3   : > { %1348 = vst.msk [vmem:[#allocation2] sm:$0xff] %vm1347_vm5, %v1345_v53 }
 0x5fa   : > { %v1463_v54 = vpop.permute.xlu1 %1462 }
 0x5fb   : > { %1466 = vst.msk [vmem:[#allocation2] sm:$0xff] %vm1465_vm6, %v1463_v54 }
 0x602   : > { %v1467_v55 = vld [vmem:[#allocation2] sm:$0xff] }
 0x603   : > { %v1468_v56 = vpack.c.bf16 %v1467_v55, %v1467_v55 }
 0x605   : > { %2898 = vmatmul.mubr.msk.bf16.vlgmr.msra.gmra.mrb[20].mxu1 %vm954_vm1, %v1468_v56 }
 0x606   : > { %2913 = vmatprep.mubr.msk.bf16.mxu1 %vm3542_vm0, %v3541_v0  ;;  %2910 = vmatpush3.bf16.msra.mxu1 %v3141_v8 }
 0x607   : > { %2911 = vmatprep.subr.bf16.mxu1 %v3541_v0 }
 0x6d8   : > { %v1529_v58 = vpop.f32.mrb[20].mxu1 }
 0x6d9   : > { %v1530_v59 = vadd.f32 %v2731_v57, %v1529_v58  ;;  %v2899_v60 = vpop.f32.mrb[21].mxu1 }
 0x6da   : > { %v1532_v61 = vpop.f32.mrb[22].mxu1 }
 0x6db   : > { %v2900_v62 = vpop.f32.mrb[23].mxu1  ;;  %v1535_v63 = vadd.f32 %v1530_v59, %v3967_v3  ;;  %v3142_v3 = vld [vmem:[%s4339_s12 + $0x8] sm:$0xff]  }
 0x6dc   : > { %2912 = vmatpush3.bf16.msra.mxu1 %v3142_v3 }
 0x6dd   : > { %v1536_v1 = vsel %vm954_vm1, %v1535_v63, 0.0  ;;  %2923 = vmatprep.subr.bf16.mxu1 %v3541_v0 }
 0x6de   : > { %1537 = vadd.xlane.f32.xlu0 %v1536_v1 }
 0x6df   : > { %2914 = vmatmul.mubr.msk.bf16.vlgmr.msra.gmra.mrb[24].mxu1 %vm954_vm1, %v1633_v11 }
 0x6e0   : > { %2925 = vmatprep.mubr.msk.bf16.mxu1 %vm3542_vm0, %v3541_v0 }
 0x76b   : > { %v1538_v2 = vpop.xlane.xlu0 %1537 }
 0x76c   : > { %v1540_v4 = vmul.f32 0.03125, %v1538_v2 }
 0x76e   : > { %v1541_v5 = vsub.f32 %v1535_v63, %v1540_v4 }
 0x770   : > { %v1542_v6 = vmul.f32 %v1541_v5, %v1541_v5 }
 0x772   : > { %v1543_v7 = vsel %vm954_vm1, %v1542_v6, 0.0 }
 0x773   : > { %1544 = vadd.xlane.f32.xlu1 %v1543_v7 }
 0x7b2   : > { %v1694_v24 = vpop.f32.mrb[24].mxu1 }
 0x7b3   : > { %v1695_v25 = vadd.f32 %v2741_v23, %v1694_v24  ;;  %v2915_v26 = vpop.f32.mrb[25].mxu1 }
 0x7b4   : > { %v1697_v27 = vpop.f32.mrb[26].mxu1 }
 0x7b5   : > { %v4109_v28 = vpack.c.bf16 %v1695_v25, %v1695_v25  ;;  %v2916_v29 = vpop.f32.mrb[27].mxu1 }
 0x7b7   : > { %1816 = vrot.lane.b32.xlu0 %v4109_v28, %s3543_s17  ;;  %v1706_v30 = vsel %vm1002_vm2, %v4109_v28, 0 }
 0x7bb   : > { %1935 = vrot.lane.b32.xlu0 %v4109_v28, %s3548_s1 }
 0x7bf   : > { %2054 = vrot.lane.b32.xlu0 %v4109_v28, %s3549_s0 }
 0x800   : > { %v1545_v14 = vpop.xlane.xlu1 %1544 }
 0x801   : > { %v1546_v15 = vmul.f32 0.03125, %v1545_v14 }
 0x803   : > { %v1547_v16 = vadd.f32 1e-05, %v1546_v15 }
 0x805   : > { %3169 = vrsqrt.f32 %v1547_v16 }
 0x80f   : > { %v3170_v17 = vpop.eup %3169 }
 0x810   : > { %v1549_v19 = vmul.f32 %v3170_v17, %v1541_v5 }
 0x812   : > { %v1557_v21 = vmul.f32 %v2735_v18, %v1549_v19 }
 0x814   : > { %v4099_v10 = vadd.f32 %v2736_v20, %v1557_v21 }
 0x816   : > { %v1566_v22 = vpack.c.bf16 %v4099_v10, %v4099_v10 }
 0x818   : > { %2906 = vmatmul.mubr.msk.bf16.vlgmr.msra.gmra.mrb[16].mxu0 %vm954_vm1, %v1566_v22 }
 0x819   : > { %2919 = vmatprep.mubr.msk.bf16.mxu0 %vm3542_vm0, %v3541_v0  ;;  %2918 = vmatpush3.bf16.xpose.msra.mxu0 %v1706_v30 }
 0x81a   : > { %2929 = vmatprep.subr.bf16.mxu0 %v3541_v0 }
 0x829   : > { %v1817_v36 = vpop.permute.xlu0 %1816 }
 0x82a   : > { %v1822_v39 = vsel %vm1002_vm2, %v1817_v36, 0 }
 0x82d   : > { %v1936_v40 = vpop.permute.xlu0 %1935 }
 0x82e   : > { %v1941_v42 = vsel %vm1002_vm2, %v1936_v40, 0 }
 0x831   : > { %v2055_v43 = vpop.permute.xlu0 %2054 }
 0x832   : > { %v2060_v45 = vsel %vm1002_vm2, %v2055_v43, 0 }
 0x8eb   : > { %v1627_v32 = vpop.f32.mrb[16].mxu0 }
 0x8ec   : > { %v1628_v33 = vadd.f32 %v2737_v31, %v1627_v32  ;;  %v2907_v34 = vpop.f32.mrb[17].mxu0 }
 0x8ed   : > { %v1630_v35 = vpop.f32.mrb[18].mxu0 }
 0x8ee   : > { %v1700_v37 = vpack.c.bf16 %v1628_v33, %v1628_v33  ;;  %v2908_v38 = vpop.f32.mrb[19].mxu0 }
 0x8f0   : > { %1814 = vrot.lane.b32.xlu1 %v1700_v37, %s3543_s17  ;;  %2920 = vmatmul.mubr.msk.bf16.vlgmr.msra.gmra.mrb[20].mxu0 %vm1002_vm2, %v1700_v37  ;;  %s2781_s17 = sshll.u32 %s3711_s7, 9 }
 0x8f1   : > { %2930 = vmatpush3.bf16.xpose.msra.mxu0 %v1822_v39  ;;  %2931 = vmatprep.mubr.msk.bf16.mxu0 %vm3542_vm0, %v3541_v0 }
 0x8f2   : > { %2941 = vmatprep.subr.bf16.mxu0 %v3541_v0 }
 0x8f4   : > { %1933 = vrot.lane.b32.xlu1 %v1700_v37, %s3548_s1 }
 0x8f8   : > { %2052 = vrot.lane.b32.xlu1 %v1700_v37, %s3549_s0  ;;  %s4424_s0 = sld [smem:[#allocation37_spill]] }
 0x8fe   : > { %s924_s27 = scalar_lea.vmem %s4424_s0, %s3955_s8  ;;  %s4164_s8 = sand.u32 1, %s3521_s2  }
 0x8ff   : > { %v929_v48 = vld [vmem:[%s924_s27] sm:$0xff]  ;;  %s4430_s27 = sld [smem:[#allocation47_spill]] }
 0x962   : > { %v1815_v41 = vpop.permute.xlu1 %1814 }
 0x963   : > { %2932 = vmatmul.mubr.msk.bf16.vlgmr.msra.gmra.mrb[24].mxu0 %vm1002_vm2, %v1815_v41 }
 0x964   : > { %2942 = vmatpush3.bf16.xpose.msra.mxu0 %v1941_v42  ;;  %2943 = vmatprep.mubr.msk.bf16.mxu0 %vm3542_vm0, %v3541_v0 }
 0x965   : > { %2953 = vmatprep.subr.bf16.mxu0 %v3541_v0 }
 0x966   : > { %v1934_v44 = vpop.permute.xlu1 %1933 }
 0x96a   : > { %v2053_v46 = vpop.permute.xlu1 %2052 }
 0x96b   : > { %2944 = vmatmul.mubr.msk.bf16.vlgmr.msra.gmra.mrb[28].mxu0 %vm1002_vm2, %v1934_v44 }
 0x96c   : > { %2954 = vmatpush3.bf16.xpose.msra.mxu0 %v2060_v45  ;;  %2955 = vmatprep.mubr.msk.bf16.mxu0 %vm3542_vm0, %v3541_v0 }
 0x96d   : > { %2965 = vmatprep.subr.bf16.mxu0 %v3541_v0 }
 0x973   : > { %2956 = vmatmul.mubr.msk.bf16.vlgmr.msra.gmra.mrb[32].mxu0 %vm1002_vm2, %v2053_v46 }
 0x974   : > { %2969 = vmatprep.mubr.msk.bf16.mxu0 %vm3542_vm0, %v3541_v0 }
 0x9c3   : > { %v1742_v47 = vpop.f32.mrb[20].mxu0 }
 0x9c4   : > { %v1748_v49 = vmul.f32 0.35355338, %v1742_v47  ;;  %v2921_v50 = vpop.f32.mrb[21].mxu0 }
 0x9c5   : > { %v1745_v51 = vpop.f32.mrb[22].mxu0 }
 0x9c6   : > { %v2922_v52 = vpop.f32.mrb[23].mxu0  ;;  %v1749_v53 = vadd.f32 %v1748_v49, %v929_v48 }
 0x9c8   : > { %v1750_v54 = vsel %vm1002_vm2, %v1749_v53, -inf }
 0x9c9   : > { %1751 = vmax.xlane.f32.xlu0 %v1750_v54 }
 0xa36   : > { %v1858_v55 = vpop.f32.mrb[24].mxu0 }
 0xa37   : > { %v1864_v56 = vmul.f32 0.35355338, %v1858_v55  ;;  %v2933_v57 = vpop.f32.mrb[25].mxu0 }
 0xa38   : > { %v1861_v58 = vpop.f32.mrb[26].mxu0 }
 0xa39   : > { %v2934_v59 = vpop.f32.mrb[27].mxu0  ;;  %v1865_v60 = vadd.f32 %v1864_v56, %v929_v48 }
 0xa3b   : > { %v1866_v61 = vsel %vm1002_vm2, %v1865_v60, -inf }
 0xa3c   : > { %1867 = vmax.xlane.f32.xlu1 %v1866_v61 }
 0xa3e   : > { %v1977_v62 = vpop.f32.mrb[28].mxu0 }
 0xa3f   : > { %v1983_v63 = vmul.f32 0.35355338, %v1977_v62  ;;  %v2945_v1 = vpop.f32.mrb[29].mxu0 }
 0xa40   : > { %v1980_v2 = vpop.f32.mrb[30].mxu0 }
 0xa41   : > { %v2946_v4 = vpop.f32.mrb[31].mxu0  ;;  %v1984_v5 = vadd.f32 %v1983_v63, %v929_v48 }
 0xa42   : > { %v3145_v4 = vld [vmem:[%s4341_s14] sm:$0xff]  }
 0xa43   : > { %v1985_v6 = vsel %vm1002_vm2, %v1984_v5, -inf  ;;  %2966 = vmatpush3.bf16.msra.mxu0 %v3145_v4 }
 0xa44   : > { %1986 = vmax.xlane.f32.xlu0 %v1985_v6  ;;  %2967 = vmatprep.subr.bf16.mxu0 %v3541_v0 }
 0xa46   : > { %v2096_v7 = vpop.f32.mrb[32].mxu0 }
 0xa47   : > { %v2102_v8 = vmul.f32 0.35355338, %v2096_v7  ;;  %v2957_v3 = vpop.f32.mrb[33].mxu0 }
 0xa48   : > { %v2099_v9 = vpop.f32.mrb[34].mxu0 }
 0xa49   : > { %v2958_v11 = vpop.f32.mrb[35].mxu0  ;;  %v2103_v12 = vadd.f32 %v2102_v8, %v929_v48 }
 0xa4b   : > { %v2104_v13 = vsel %vm1002_vm2, %v2103_v12, -inf }
 0xa4c   : > { %2105 = vmax.xlane.f32.xlu0 %v2104_v13 }
 0xa56   : > { %v1752_v14 = vpop.xlane.xlu0 %1751 }
 0xa57   : > { %v1753_v15 = vsub.f32 %v1749_v53, %v1752_v14 }
 0xa59   : > { %v1754_v16 = vmul.f32 1.442695, %v1753_v15 }
 0xa5b   : > { %3171 = vpow2.f32 %v1754_v16 }
 0xa65   : > { %v3172_v17 = vpop.eup %3171 }
 0xa66   : > { %v1756_v18 = vsel %vm1002_vm2, %v3172_v17, 0.0 }
 0xa67   : > { %1757 = vadd.xlane.f32.xlu1 %v1756_v18 }
 0xa78   : > { %1764 = vrot.lane.b32.xlu1 %v4109_v28, %s3544_s22  ;;  %s2714_s22 = sshll.u32 %s4164_s8, 5 }
 0xac9   : > { %v1868_v19 = vpop.xlane.xlu1 %1867 }
 0xaca   : > { %v1869_v20 = vsub.f32 %v1865_v60, %v1868_v19  ;;  %v2756_v19 = vld [vmem:[%s4342_s15] ss:$0 sm:$0xff] }
 0xacc   : > { %v1870_v21 = vmul.f32 1.442695, %v1869_v20 }
 0xace   : > { %3173 = vpow2.f32 %v1870_v21 }
 0xad1   : > { %v1987_v22 = vpop.xlane.xlu0 %1986 }
 0xad2   : > { %v1988_v23 = vsub.f32 %v1984_v5, %v1987_v22  ;;  %v3146_v5 = vld [vmem:[%s4341_s14 + $0x8] sm:$0xff]  }
 0xad3   : > { %2968 = vmatpush3.bf16.msra.mxu0 %v3146_v5 }
 0xad4   : > { %v1989_v24 = vmul.f32 1.442695, %v1988_v23  ;;  %2981 = vmatprep.subr.bf16.mxu0 %v3541_v0 }
 0xad6   : > { %3175 = vpow2.f32 %v1989_v24 }
 0xad8   : > { %v3174_v25 = vpop.eup %3173 }
 0xad9   : > { %v2106_v26 = vpop.xlane.xlu0 %2105  ;;  %v1872_v27 = vsel %vm1002_vm2, %v3174_v25, 0.0 }
 0xada   : > { %v2107_v29 = vsub.f32 %v2103_v12, %v2106_v26  ;;  %1873 = vadd.xlane.f32.xlu0 %v1872_v27 }
 0xadc   : > { %v2108_v30 = vmul.f32 1.442695, %v2107_v29 }
 0xade   : > { %3177 = vpow2.f32 %v2108_v30 }
 0xae0   : > { %v3176_v31 = vpop.eup %3175 }
 0xae1   : > { %v1991_v32 = vsel %vm1002_vm2, %v3176_v31, 0.0 }
 0xae2   : > { %1992 = vadd.xlane.f32.xlu1 %v1991_v32 }
 0xae8   : > { %v3178_v33 = vpop.eup %3177 }
 0xae9   : > { %v2110_v34 = vsel %vm1002_vm2, %v3178_v33, 0.0 }
 0xaea   : > { %2111 = vadd.xlane.f32.xlu0 %v2110_v34  ;;  %v3148_v34 = vld [vmem:[#allocation11 + $0x8] sm:$0xff]  }
 0xaf3   : > { %1999 = vrot.lane.b32.xlu1 %v4109_v28, %s3545_s30  ;;  %s4170_s30 = scalar_lea.vmem [#allocation18], %s2714_s22  ;;  %s4248_s22 = scalar_lea.hbm %s4430_s27, %s2781_s17 }
 0xaf4   : > { %v1758_v35 = vpop.xlane.xlu1 %1757 }
 0xaf5   : > { %3179 = vrcp.f32 %v1758_v35  ;;  %v3150_v35 = vld [vmem:[%s4347_s20 + $0x8] sm:$0xff]  }
 0xaf7   : > { %2118 = vrot.lane.b32.xlu1 %v4109_v28, %s3547_s3  ;;  %s4426_s3 = smov 8  }
 0xaf8   : > { %v1765_v36 = vpop.permute.xlu1 %1764 }
 0xaf9   : > { %v1770_v37 = vsel %vm1068_vm3, %v1765_v36, 0 }
 0xafa   : > { %2924 = vmatpush3.bf16.msra.mxu1 %v1770_v37 }
 0xafb   : > { %2935 = vmatprep.subr.bf16.mxu1 %v3541_v0 }
 0xaff   : > { %v3180_v38 = vpop.eup %3179 }
 0xb00   : > { %v1760_v39 = vmul.f32 %v3180_v38, %v3172_v17  ;;  %1880 = vrot.lane.b32.xlu0 %v4109_v28, %s4425_s29  ;;  %s2458_s29 = scalar_lea.sflag [#allocation19], %s4164_s8 }
 0xb02   : > { %v1762_v40 = vpack.c.bf16 %v1760_v39, %v1760_v39  ;;  %1761 = vst.msk [vmem:[%s4170_s30] sm:$0xff] %vm1002_vm2, %v1760_v39 }
 0xb04   : > { %2926 = vmatmul.mubr.msk.bf16.vlgmr.msra.gmra.mrb[28].mxu1 %vm1002_vm2, %v1762_v40  ;;  %v2760_v40 = vld [vmem:[#allocation8] ss:$0 sm:$0xff] }
 0xb05   : > { %2937 = vmatprep.mubr.msk.bf16.mxu1 %vm3542_vm0, %v3541_v0 }
 0xb67   : > { %v1874_v41 = vpop.xlane.xlu0 %1873 }
 0xb68   : > { %3181 = vrcp.f32 %v1874_v41 }
 0xb6f   : > { %v1993_v42 = vpop.xlane.xlu1 %1992 }
 0xb70   : > { %3183 = vrcp.f32 %v1993_v42  ;;  %v2761_v42 = vld [vmem:[#allocation9] ss:$0 sm:$0xff] }
 0xb72   : > { %v3182_v43 = vpop.eup %3181 }
 0xb73   : > { %v1876_v44 = vmul.f32 %v3182_v43, %v3174_v25  ;;  %v2000_v49 = vpop.permute.xlu1 %1999 }
 0xb74   : > { %v2005_v51 = vsel %vm1068_vm3, %v2000_v49, 0 }
 0xb75   : > { %2748 = vst.msk [vmem:[%s4170_s30 + $0x8] sm:$0xff] %vm1002_vm2, %v1876_v44  ;;  %v1879_v50 = vpack.c.bf16 %v1876_v44, %v1876_v44 }
 0xb77   : > { %v2112_v28 = vpop.xlane.xlu0 %2111  ;;  %v2119_v54 = vpop.permute.xlu1 %2118 }
 0xb78   : > { %3185 = vrcp.f32 %v2112_v28  ;;  %v2124_v56 = vsel %vm1068_vm3, %v2119_v54, 0 }
 0xb7a   : > { %v3184_v45 = vpop.eup %3183 }
 0xb7b   : > { %v1995_v46 = vmul.f32 %v3184_v45, %v3176_v31  ;;  %v1881_v47 = vpop.permute.xlu0 %1880  ;;  %v3151_v45 = vld [vmem:[%s4347_s20 + $0x10] sm:$0xff]  }
 0xb7c   : > { %v1886_v48 = vsel %vm1068_vm3, %v1881_v47, 0  ;;  %v2762_v47 = vld [vmem:[#allocation12] ss:$0 sm:$0xff] }
 0xb7d   : > { %2936 = vmatpush3.bf16.msra.mxu1 %v1886_v48  ;;  %2751 = vst.msk [vmem:[%s4170_s30 + $0x10] sm:$0xff] %vm1002_vm2, %v1995_v46  ;;  %v1998_v55 = vpack.c.bf16 %v1995_v46, %v1995_v46  ;;  %v3152_v46 = vld [vmem:[%s4347_s20 + $0x18] sm:$0xff]  }
 0xb7e   : > { %2947 = vmatprep.subr.bf16.mxu1 %v3541_v0 }
 0xb80   : > { %2938 = vmatmul.mubr.msk.bf16.vlgmr.msra.gmra.mrb[32].mxu1 %vm1002_vm2, %v1879_v50 }
 0xb81   : > { %2948 = vmatpush3.bf16.msra.mxu1 %v2005_v51  ;;  %2949 = vmatprep.mubr.msk.bf16.mxu1 %vm3542_vm0, %v3541_v0 }
 0xb82   : > { %v3186_v52 = vpop.eup %3185  ;;  %2959 = vmatprep.subr.bf16.mxu1 %v3541_v0 }
 0xb83   : > { %v2114_v53 = vmul.f32 %v3186_v52, %v3178_v33  ;;  %v3147_v33 = vld [vmem:[#allocation11] sm:$0xff]  }
 0xb85   : > { %2754 = vst.msk [vmem:[%s4170_s30 + $0x18] sm:$0xff] %vm1002_vm2, %v2114_v53  ;;  %v2117_v57 = vpack.c.bf16 %v2114_v53, %v2114_v53 }
 0xb88   : > { %2950 = vmatmul.mubr.msk.bf16.vlgmr.msra.gmra.mrb[36].mxu1 %vm1002_vm2, %v1998_v55  ;;  %v2766_v55 = vld [vmem:[#allocation14] ss:$0 sm:$0xff] }
 0xb89   : > { %2960 = vmatpush3.bf16.msra.mxu1 %v2124_v56  ;;  %2961 = vmatprep.mubr.msk.bf16.mxu1 %vm3542_vm0, %v3541_v0 }
 0xb8a   : > { %2973 = vmatprep.subr.bf16.mxu1 %v3541_v0 }
 0xb90   : > { %2962 = vmatmul.mubr.msk.bf16.vlgmr.msra.gmra.mrb[40].mxu1 %vm1002_vm2, %v2117_v57 }
 0xb91   : > { %2977 = vmatprep.mubr.msk.bf16.mxu1 %vm3542_vm0, %v3541_v0  ;;  %2974 = vmatpush3.bf16.msra.mxu1 %v3147_v33 }
 0xb92   : > { %2975 = vmatprep.subr.bf16.mxu1 %v3541_v0 }
 0xb95   : > { %2976 = vmatpush3.bf16.msra.mxu1 %v3148_v34 }
 0xbd7   : > { %v1806_v58 = vpop.f32.mrb[28].mxu1 }
 0xbd8   : > { %1812 = vst.msk [vmem:[#allocation2] sm:$0xff] %vm1002_vm2, %v1806_v58  ;;  %v2927_v59 = vpop.f32.mrb[29].mxu1 }
 0xbd9   : > { %v1809_v60 = vpop.f32.mrb[30].mxu1 }
 0xbda   : > { %v2928_v61 = vpop.f32.mrb[31].mxu1 }
 0xc53   : > { %v1922_v62 = vpop.f32.mrb[32].mxu1 }
 0xc54   : > { %1929 = vrot.lane.b32.xlu0 %v1922_v62, %s4426_s3  ;;  %v2939_v63 = vpop.f32.mrb[33].mxu1 }
 0xc55   : > { %v1925_v1 = vpop.f32.mrb[34].mxu1 }
 0xc56   : > { %v2940_v2 = vpop.f32.mrb[35].mxu1 }
 0xc5b   : > { %v2041_v6 = vpop.f32.mrb[36].mxu1 }
 0xc5c   : > { %2048 = vrot.lane.b32.xlu1 %v2041_v6, %s4427_s26  ;;  %v2951_v7 = vpop.f32.mrb[37].mxu1  ;;  %s4429_s26 = sld [smem:[#allocation32_spill]] }
 0xc5d   : > { %v2044_v8 = vpop.f32.mrb[38].mxu1 }
 0xc5e   : > { %v2952_v3 = vpop.f32.mrb[39].mxu1 }
 0xc62   : > { %p4431_p11 = scmp.ne.s32.totalorder %s4429_s26, 0 }
 0xc63   : > { %v2160_v9 = vpop.f32.mrb[40].mxu1 }
 0xc64   : > { %2167 = vrot.lane.b32.xlu0 %v2160_v9, %s4428_s6  ;;  %v2963_v11 = vpop.f32.mrb[41].mxu1  ;;  %s2484_s6 = sshll.u32 %s4170_s30, 4  ;;  %s3421_s30 = scalar_lea.vmem %s3420_s9, 1024  ;;  %s4243_s6 = int_to_ptr.vmem [resolvable:$true] %s2484_s6 }
 0xc65   : > { %v2163_v12 = vpop.f32.mrb[42].mxu1  ;;  %s3415_s24 = scalar_lea.vmem %s4243_s6, 512  ;;  %p3422_p1 = scmp.lt.s32.totalorder %s4243_s6, %s3420_s9 }
 0xc66   : > { %v2964_v13 = vpop.f32.mrb[43].mxu1  ;;  %p3416_p8 = scmp.ne.s32.totalorder %s4243_s6, %s3415_s24  ;;  %p3423_p6 = scmp.lt.s32.totalorder %s3421_s30, %s3415_s24 }
 0xc68   : > { %p3417_p13 = pnand %p3416_p8, %p4431_p11  ;;  %p3424_p5 = por %p3423_p6, %p3422_p1 }
 0xc6a   : > { %p3418_p0 = pneg %p3417_p13 }
 0xc6c   : > { %p3425_p9 = pnand %p3424_p5, %p3418_p0 }
 0xcc6   : > { %v1930_v14 = vpop.permute.xlu0 %1929 }
 0xcc7   : > { %1932 = vst.msk [vmem:[#allocation2] sm:$0xff] %vm1229_vm4, %v1930_v14 }
 0xcce   : > { %v2049_v15 = vpop.permute.xlu1 %2048 }
 0xccf   : > { %2051 = vst.msk [vmem:[#allocation2] sm:$0xff] %vm1347_vm5, %v2049_v15 }
 0xcd6   : > { %v2168_v16 = vpop.permute.xlu0 %2167 }
 0xcd7   : > { %2170 = vst.msk [vmem:[#allocation2] sm:$0xff] %vm1465_vm6, %v2168_v16 }
 0xcde   : > { %v2171_v17 = vld [vmem:[#allocation2] sm:$0xff] }
 0xcdf   : > { %v2172_v18 = vpack.c.bf16 %v2171_v17, %v2171_v17 }
 0xce1   : > { %2970 = vmatmul.mubr.msk.bf16.vlgmr.msra.gmra.mrb[36].mxu0 %vm954_vm1, %v2172_v18 }
 0xce2   : > { %2989 = vmatprep.mubr.msk.bf16.mxu0 %vm3542_vm0, %v3541_v0 }
 0xdb4   : > { %v2233_v20 = vpop.f32.mrb[36].mxu0 }
 0xdb5   : > { %v2234_v21 = vadd.f32 %v2756_v19, %v2233_v20  ;;  %v2971_v22 = vpop.f32.mrb[37].mxu0 }
 0xdb6   : > { %v2236_v23 = vpop.f32.mrb[38].mxu0 }
 0xdb7   : > { %v2972_v24 = vpop.f32.mrb[39].mxu0  ;;  %v2239_v25 = vadd.f32 %v2234_v21, %v4099_v10  ;;  %v3149_v10 = vld [vmem:[%s4347_s20] sm:$0xff]  }
 0xdb8   : > { %2982 = vmatpush3.bf16.msra.mxu0 %v3149_v10 }
 0xdb9   : > { %v2240_v26 = vsel %vm954_vm1, %v2239_v25, 0.0  ;;  %2983 = vmatprep.subr.bf16.mxu0 %v3541_v0 }
 0xdba   : > { %2241 = vadd.xlane.f32.xlu1 %v2240_v26 }
 0xdbc   : > { %2984 = vmatpush3.bf16.msra.mxu0 %v3150_v35 }
 0xdbd   : > { %2985 = vmatprep.subr.bf16.mxu0 %v3541_v0 }
 0xdc0   : > { %2986 = vmatpush3.bf16.msra.mxu0 %v3151_v45 }
 0xdc1   : > { %2987 = vmatprep.subr.bf16.mxu0 %v3541_v0 }
 0xdc4   : > { %2988 = vmatpush3.bf16.msra.mxu0 %v3152_v46 }
 0xe47   : > { %v2242_v27 = vpop.xlane.xlu1 %2241 }
 0xe48   : > { %v2243_v29 = vmul.f32 0.03125, %v2242_v27 }
 0xe4a   : > { %v2244_v30 = vsub.f32 %v2239_v25, %v2243_v29 }
 0xe4c   : > { %v2245_v31 = vmul.f32 %v2244_v30, %v2244_v30 }
 0xe4e   : > { %v2246_v32 = vsel %vm954_vm1, %v2245_v31, 0.0 }
 0xe4f   : > { %2247 = vadd.xlane.f32.xlu0 %v2246_v32 }
 0xedc   : > { %v2248_v36 = vpop.xlane.xlu0 %2247 }
 0xedd   : > { %v2249_v37 = vmul.f32 0.03125, %v2248_v36 }
 0xedf   : > { %v2250_v38 = vadd.f32 1e-05, %v2249_v37 }
 0xee1   : > { %3187 = vrsqrt.f32 %v2250_v38 }
 0xeeb   : > { %v3188_v39 = vpop.eup %3187 }
 0xeec   : > { %v2252_v41 = vmul.f32 %v3188_v39, %v2244_v30 }
 0xeee   : > { %v2260_v43 = vmul.f32 %v2760_v40, %v2252_v41 }
 0xef0   : > { %v2268_v44 = vadd.f32 %v2761_v42, %v2260_v43 }
 0xef2   : > { %v2269_v28 = vpack.c.bf16 %v2268_v44, %v2268_v44 }
 0xef4   : > { %2978 = vmatmul.mubr.msk.bf16.vlgmr.msra.gmra.mrb[44].mxu1 %vm954_vm1, %v2269_v28 }
 0xfc7   : > { %v2330_v48 = vpop.f32.mrb[44].mxu1 }
 0xfc8   : > { %v2331_v49 = vadd.f32 %v2762_v47, %v2330_v48  ;;  %v2979_v50 = vpop.f32.mrb[45].mxu1 }
 0xfc9   : > { %v2333_v51 = vpop.f32.mrb[46].mxu1 }
 0xfca   : > { %v2336_v52 = vmax.f32 %v2331_v49, 0.0  ;;  %v2980_v53 = vpop.f32.mrb[47].mxu1 }
 0xfcc   : > { %v2337_v54 = vpack.c.bf16 %v2336_v52, %v2336_v52 }
 0xfce   : > { %2990 = vmatmul.mubr.msk.bf16.vlgmr.msra.gmra.mrb[40].mxu0 %vm2377_vm7, %v2337_v54 }
0x10a1   : > { %v2415_v56 = vpop.f32.mrb[40].mxu0 }
0x10a2   : > { %v2416_v0 = vadd.f32 %v2766_v55, %v2415_v56  ;;  %v2991_v57 = vpop.f32.mrb[41].mxu0 }
0x10a3   : > { %v2418_v58 = vpop.f32.mrb[42].mxu0 }
0x10a4   : > { %v2992_v59 = vpop.f32.mrb[43].mxu0  ;;  %v2421_v60 = vadd.f32 %v2416_v0, %v2268_v44 }
0x10a6   : > { %v2422_v61 = vsel %vm954_vm1, %v2421_v60, 0.0 }
0x10a7   : > { %2423 = vadd.xlane.f32.xlu0 %v2422_v61 }
0x1134   : > { %v2424_v62 = vpop.xlane.xlu0 %2423 }
0x1135   : > { %v2425_v63 = vmul.f32 0.03125, %v2424_v62 }
0x1137   : > { %v2426_v1 = vsub.f32 %v2421_v60, %v2425_v63 }
0x1139   : > { %v2427_v2 = vmul.f32 %v2426_v1, %v2426_v1 }
0x113b   : > { %v2428_v4 = vsel %vm954_vm1, %v2427_v2, 0.0 }
0x113c   : > { %2429 = vadd.xlane.f32.xlu1 %v2428_v4 }
0x113d   : > { %3428 = shalt.err (!%p3425_p9)
}
0x113e   : > { %s3429_s28 = scalar_lea.hbm %s4248_s22, 512  ;;  %s3433_s0 = scalar_lea.hbm %s4430_s27, 1024 }
0x113f   : > { %p3430_p12 = scmp.ne.s32.totalorder %s4248_s22, %s3429_s28  ;;  %p3434_p3 = scmp.lt.u32.totalorder %s4248_s22, %s4430_s27 }
0x1140   : > { %p3435_p4 = scmp.lt.u32.totalorder %s3433_s0, %s3429_s28  ;;  %p3437_p8 = scmp.lt.u32.totalorder %s3429_s28, %s4248_s22 }
0x1141   : > { %p3431_p10 = pnand %p3430_p12, %p4431_p11 }
0x1142   : > { %p3436_p7 = por %p3435_p4, %p3434_p3 }
0x1143   : > { %p3432_p2 = pneg %p3431_p10 }
0x1144   : > { %p3438_p13 = por %p3437_p8, %p3436_p7 }
0x1146   : > { %p3439_p0 = pnand %p3438_p13, %p3432_p2 }
0x1148   : > { %3442 = shalt.err (!%p3439_p0)
}
0x1149   : > { %s3558_s24 = smov 128   ;;  %s2713_s30 = sshll.u32 %s4164_s8, 3  ;;  %v2773_v11 = vld [vmem:[#allocation15] ss:$0 sm:$0xff] }
0x114a   : > { %3026 = dma.vmem_to_hbm [thread:$0]  (%p4431_p11), %s4243_s6, 512, %s4248_s22, %s2458_s29, %s3558_s24, %s3558_s24, %s4426_s3  }
0x114b   : > { %s4432_s1 = sld [smem:[#allocation45_spill]]  ;;  %s2776_s0 = sshll.u32 %s3711_s7, 7 }
0x114c   : > { %s901_s5 = scalar_lea.vmem [#allocation17], %s2713_s30  ;;  %s4433_s22 = sld [smem:[#allocation46_spill]] }
0x114d   : > { %s2471_s9 = sshll.u32 %s901_s5, 4  ;;  %s2453_s24 = scalar_lea.sflag [#allocation5], %s4164_s8  ;;  %s4285_s9 = int_to_ptr.vmem [resolvable:$true] %s2471_s9 }
0x114e   : > { %s3443_s28 = scalar_lea.vmem %s4285_s9, 128  ;;  %s3559_s7 = smov [#allocation17]  }
0x114f   : > { %p3444_p1 = scmp.ne.s32.totalorder %s4285_s9, %s3443_s28  ;;  %s3447_s30 = sshll.u32 %s3559_s7, 4  ;;  %s3448_s30 = int_to_ptr.vmem [resolvable:$false] %s3447_s30 }
0x1150   : > { %s3449_s17 = scalar_lea.vmem %s3448_s30, 256  ;;  %p3450_p9 = scmp.lt.s32.totalorder %s4285_s9, %s3448_s30 }
0x1151   : > { %v2772_v3 = vld [vmem:[%s4432_s1] ss:$0 sm:$0xff]  ;;  %p3445_p6 = pnand %p3444_p1, %p4431_p11  ;;  %p3451_p12 = scmp.lt.s32.totalorder %s3449_s17, %s3443_s28 }
0x1152   : > { %s4283_s29 = scalar_lea.hbm %s4433_s22, %s2776_s0 }
0x1153   : > { %p3446_p5 = pneg %p3445_p6  ;;  %p3452_p10 = por %p3451_p12, %p3450_p9 }
0x1155   : > { %p3453_p2 = pnand %p3452_p10, %p3446_p5 }
0x11c9   : > { %v2430_v5 = vpop.xlane.xlu1 %2429 }
0x11ca   : > { %v2431_v6 = vmul.f32 0.03125, %v2430_v5 }
0x11cc   : > { %v2432_v7 = vadd.f32 1e-05, %v2431_v6 }
0x11ce   : > { %3189 = vrsqrt.f32 %v2432_v7 }
0x11d8   : > { %v3190_v8 = vpop.eup %3189 }
0x11d9   : > { %v2434_v9 = vmul.f32 %v3190_v8, %v2426_v1 }
0x11db   : > { %v2442_v12 = vmul.f32 %v2772_v3, %v2434_v9 }
0x11dd   : > { %v2450_v13 = vadd.f32 %v2773_v11, %v2442_v12 }
0x11df   : > { %2451 = vst.msk [vmem:[%s901_s5] sm:$0xff] %vm954_vm1, %v2450_v13 }
0x11e0   : > { %3456 = shalt.err (!%p3453_p2)
}
0x11e1   : > { %s3457_s8 = scalar_lea.hbm %s4283_s29, 128  ;;  %s3461_s5 = scalar_lea.hbm %s4433_s22, 256 }
0x11e2   : > { %p3458_p3 = scmp.ne.s32.totalorder %s4283_s29, %s3457_s8  ;;  %p3462_p8 = scmp.lt.u32.totalorder %s4283_s29, %s4433_s22 }
0x11e3   : > { %p3463_p13 = scmp.lt.u32.totalorder %s3461_s5, %s3457_s8  ;;  %p3465_p1 = scmp.lt.u32.totalorder %s3457_s8, %s4283_s29 }
0x11e4   : > { %p3459_p4 = pnand %p3458_p3, %p4431_p11 }
0x11e5   : > { %p3464_p0 = por %p3463_p13, %p3462_p8 }
0x11e6   : > { %p3460_p7 = pneg %p3459_p4 }
0x11e7   : > { %p3466_p6 = por %p3465_p1, %p3464_p0 }
0x11e9   : > { %p3467_p5 = pnand %p3466_p6, %p3460_p7 }
0x11eb   : > { %3470 = shalt.err (!%p3467_p5)
}
0x11ec   : > { %3025 = dma.vmem_to_hbm [thread:$0]  (%p4431_p11), %s4285_s9, 128, %s4283_s29, %s2453_s24  }
0x11ed PF: > { %s4434_s28 = sld [smem:[#allocation29_spill]]  ;;  %s4435_s7 = sld [smem:[#allocation27_spill]] }
0x11ee   : > { %s4436_s30 = sld [smem:[#allocation33_spill]] }
0x11f3   : > { %p3077_p9 = scmp.ge.s32.totalorder %s4434_s28, 2  ;;  %s2499_s17 = sand.u32 1, %s4435_s7  }
0x11f4   : > { %p4437_p12 = scmp.ne.s32.totalorder %s4436_s30, 0  ;;  %s2500_s1 = scalar_lea.sflag [#allocation5], %s2499_s17 }
0x11f6   : > { %p3055_p10 = pnand %p3077_p9, %p4437_p12 }
0x11f8   : > { %3508 = dma.done.wait (!%p3055_p10), %s2500_s1, 128  }
0x11f9   : > { %3510 = vsyncadd (!%p3055_p10), %s2500_s1, 4294967168  ;;  %s2509_s8 = scalar_lea.sflag [#allocation19], %s2499_s17 }
0x11fa   : > { %3512 = dma.done.wait (!%p3055_p10), %s2509_s8, 512  }
0x11fb   : > { %3514 = vsyncadd (!%p3055_p10), %s2509_s8, 4294966784  ;;  %s4438_s30 = sld [smem:[#allocation30_spill]]  ;;  %s4439_s26 = sld [smem:[#allocation28_spill]] }
0x11fc   : > { %s4440_s6 = sld [smem:[#allocation31_spill]]  ;;  %s4441_s29 = smov %s3521_s2 }
0x1201   : > { %p44_p11 = scmp.ge.s32.totalorder %s4438_s30, 4   ;;  %s4442_s2 = smov %s4439_s26 }
0x1203   :  { %46 = sbr.rel (!%p44_p11) target bundleno = 25 (0x19), region = 213 }
0x120a   :  { %2514 = vsyncpa [#allocation4], 1 }
0x120b   :  { %2516 = vsyncpa [#allocation4 + $0x1], 1 }
0x120c   :  { %2517 = vsyncpa [#allocation7], 1 }
0x120d   :  { %2518 = vsyncpa [#allocation10], 1 }
0x120e   :  { %2519 = vsyncpa [#allocation13], 1 }
0x120f   :  { %2520 = vsyncpa [#allocation16], 1 }
0x1210   :  { %2521 = vsyncpa [#allocation5], 1 }
0x1211   :  { %2523 = vsyncpa [#allocation5 + $0x1], 1 }
0x1212   :  { %2524 = vsyncpa [#allocation19], 1 }
0x1213   :  { %2526 = vsyncpa [#allocation19 + $0x1], 1 }

</bundles_post_ra>
